<compile_context>
chip_gen: v5e
topology: v5e:2x2
jax: 0.10.0
libtpu: 0.0.40
codegen_flags: <defaults>
</compile_context>

<pallas_src>
import functools
import math

import jax
import jax.numpy as jnp
from jax.experimental import pallas as pl
from jax.experimental.pallas import tpu as pltpu


# ----------------------------------------------------------------------------
# Pure-JAX reference (PyTorch-layout parameters, f32) used only for validation.
# ----------------------------------------------------------------------------
def _gru_cell_ref(x, h, w_ih, w_hh, b_ih, b_hh, H):
    gi = jnp.dot(x, w_ih.T, preferred_element_type=jnp.float32) + b_ih
    gh = jnp.dot(h, w_hh.T, preferred_element_type=jnp.float32) + b_hh
    r = jax.nn.sigmoid(gi[:, :H] + gh[:, :H])
    z = jax.nn.sigmoid(gi[:, H:2 * H] + gh[:, H:2 * H])
    n = jnp.tanh(gi[:, 2 * H:] + r * gh[:, 2 * H:])
    return (1.0 - z) * n + z * h


def _gru_stack_ref(steps, layer_params, H):
    """Multi-layer GRU over a short sequence (h0 = 0); returns last-step output
    of the last layer.  layer_params: list of (w_ih, w_hh, b_ih, b_hh)."""
    inputs = steps
    B = steps[0].shape[0]
    for (w_ih, w_hh, b_ih, b_hh) in layer_params:
        h = jnp.zeros((B, H), jnp.float32)
        outs = []
        for xt in inputs:
            h = _gru_cell_ref(xt, h, w_ih, w_hh, b_ih, b_hh, H)
            outs.append(h)
        inputs = outs
    return inputs[-1]


def _model_forward_ref(x, z, gru_params, fc_w, fc_b, hidden, num_gru):
    """Exact re-implementation of GRUModel.forward (batch-first)."""
    G = num_gru - 1
    total_loss = jnp.float32(0.0)
    prev = None
    for i in range(G - 1):                        # loop iterations that do work
        if i == 0:
            t0, t1 = x[:, 0, :], x[:, 1, :]
        else:
            t0, t1 = x[:, i + 1, :], prev         # torch.cat((y, out), dim=1)
        target = x[:, i + 2, :]
        h = _gru_stack_ref([t0, t1], gru_params[i], hidden)
        prev = jnp.dot(h, fc_w.T, preferred_element_type=jnp.float32) + fc_b
        total_loss = total_loss + jnp.mean((prev - target) ** 2)
    # Post-loop: uses the *last* GRU of the ModuleList (loop variable `gru`).
    h = _gru_stack_ref([x[:, G, :], prev], gru_params[G - 1], hidden)
    final = jnp.dot(h, fc_w.T, preferred_element_type=jnp.float32) + fc_b
    total_loss = total_loss + jnp.mean((final - z) ** 2)
    return final, total_loss


# ----------------------------------------------------------------------------
# Host-side parameter packing into MXU-friendly slabs.
# ----------------------------------------------------------------------------
def pack_params(gru_params, fc_w, fc_b, input_size, hidden, output_size, num_layers):
    """Repack PyTorch-layout GRU/Linear params into four slabs.

    Per-cell packed layout (k = stack*L + layer), gate columns [r | z | n_ih | n_hh]:
      wx[k]: (H, 4H)   input->gates  [Wr^T | Wz^T | Wn^T | 0], zero rows past in_dim
      wh[k]: (H, 4H)   hidden->gates [Ur^T | Uz^T | 0 | Un^T]
      b[k]:  (4H,)     fused bias    [bi_r+bh_r | bi_z+bh_z | bi_n | bh_n]

    Returned slabs:
      wbd (2L, G*H, G*4H) bf16 : block-diagonal [wx per layer, then wh per layer] for the
                                  batched off-chain t0 precompute.
      bbd (2L, 1,   G*4H) f32  : matching biases; the wh/layer-0 row also carries the
                                  folded FC bias b_link[s] for stacks s >= 1.
      wxc (G*L+1, H, 4H)  bf16 : on-chain input->gate weights.  Entry (s,0) for s>=1 is
                                  the FC-folded link weight fc_w_pad.T @ wx0[s]; the last
                                  entry is the zero-padded FC weight itself.
      fcb (1, 4H)         f32  : zero-padded FC bias.
    """
    H = hidden
    L = num_layers
    O = output_size
    G = len(gru_params)
    H4 = 4 * H

    wx_cells, wh_cells, b_cells = [], [], []
    for layers in gru_params:
        assert len(layers) == L
        for (w_ih, w_hh, b_ih, b_hh) in layers:
            in_dim = w_ih.shape[1]
            wx = jnp.zeros((H, H4), jnp.float32)
            wx = wx.at[:in_dim, 0:H].set(w_ih[:H].T)
            wx = wx.at[:in_dim, H:2 * H].set(w_ih[H:2 * H].T)
            wx = wx.at[:in_dim, 2 * H:3 * H].set(w_ih[2 * H:].T)
            wh = jnp.concatenate(
                [w_hh[:H].T, w_hh[H:2 * H].T,
                 jnp.zeros((H, H), jnp.float32), w_hh[2 * H:].T], axis=1)
            b = jnp.concatenate(
                [b_ih[:H] + b_hh[:H], b_ih[H:2 * H] + b_hh[H:2 * H],
                 b_ih[2 * H:], b_hh[2 * H:]])
            wx_cells.append(wx)
            wh_cells.append(wh)
            b_cells.append(b)

    fcw_full = jnp.zeros((H, H4), jnp.float32).at[:, :O].set(fc_w.T)
    fcb_full = jnp.zeros((1, H4), jnp.float32).at[0, :O].set(fc_b)
    fcwT_pad = jnp.zeros((H, H), jnp.float32).at[:, :O].set(fc_w.T)
    fcb_pad = jnp.zeros((1, H), jnp.float32).at[0, :O].set(fc_b)

    # ---- block-diagonal prologue slabs (off-chain t0 precompute) ------------
    GH, G4H = G * H, G * H4
    wbd = jnp.zeros((2 * L, GH, G4H), jnp.float32)
    bbd = jnp.zeros((2 * L, 1, G4H), jnp.float32)
    for l in range(L):
        for s in range(G):
            idx = s * L + l
            r0, c0 = s * H, s * H4
            wbd = wbd.at[l, r0:r0 + H, c0:c0 + H4].set(wx_cells[idx])
            wbd = wbd.at[L + l, r0:r0 + H, c0:c0 + H4].set(wh_cells[idx])
            bbd = bbd.at[l, 0, c0:c0 + H4].set(b_cells[idx])
            bh = b_cells[idx]
            if l == 0 and s >= 1:
                # Folded FC bias of the link prev_out = cur@fc_w^T + fc_b.
                bh = bh + (fcb_pad @ wx_cells[s * L])[0]
            bbd = bbd.at[L + l, 0, c0:c0 + H4].set(bh)

    # ---- on-chain slab (FC folded into layer-0 weights for stacks s >= 1) ---
    wxc = []
    for s in range(G):
        for l in range(L):
            idx = s * L + l
            if l == 0 and s >= 1:
                wxc.append(fcwT_pad @ wx_cells[idx])       # (H, 4H) link weight
            else:
                wxc.append(wx_cells[idx])
    wxc.append(fcw_full)
    wxc = jnp.stack(wxc)                                   # (G*L+1, H, 4H)

    return (wbd.astype(jnp.bfloat16), bbd,
            wxc.astype(jnp.bfloat16), fcb_full)


# ----------------------------------------------------------------------------
# Pallas kernel + wrapper
# ----------------------------------------------------------------------------
def make_gru_model(batch, seq, input_size, hidden, num_layers, output_size, num_gru):
    assert output_size == input_size, "cat/MSE in forward require output_size == input_size"
    assert input_size <= hidden, "packing pads layer-0 inputs to `hidden` columns"
    assert seq >= num_gru, "forward reads x[:, num_gru-1, :]"
    assert num_gru >= 3
    G = num_gru - 1          # number of nn.GRU stacks in the ModuleList
    L = num_layers
    H = hidden
    O = output_size
    H4 = 4 * H
    B_pad = ((batch + 7) // 8) * 8      # sublane-dense batch
    GL = G * L

    def kernel(x_ref, x0_ref, z_ref, wbd_ref, bbd_ref, wxc_ref, fcb_ref,
               out_ref, loss_ref):
        f32 = jnp.float32
        bf16 = jnp.bfloat16

        def gates_t0(g):                       # first time step: h_prev == 0
            rz = jax.nn.sigmoid(g[:, :2 * H])
            r, zg = rz[:, :H], rz[:, H:]
            n = jnp.tanh(g[:, 2 * H:3 * H] + r * g[:, 3 * H:])
            return n - zg * n

        def gates_t1(g, h_prev):               # second time step
            rz = jax.nn.sigmoid(g[:, :2 * H])
            r, zg = rz[:, :H], rz[:, H:]
            n = jnp.tanh(g[:, 2 * H:3 * H] + r * g[:, 3 * H:])
            return n + zg * (h_prev - n)

        # ---- OFF-CHAIN prologue: t0 hidden states of every stack and the
        #      recurrent halves (hh_pre) of the t1 gate pre-activations,
        #      batched across stacks with block-diagonal (G*H, G*4H) weights. --
        hstate = [[None] * L for _ in range(G)]   # hstate[s][l]: (B_pad, H) f32
        hh_pre = [[None] * L for _ in range(G)]   # hh_pre[s][l]: (B_pad, 4H) f32
        h_pack = x0_ref[...]                      # (B_pad, G*H) bf16
        for l in range(L):
            g = jnp.dot(h_pack, wbd_ref[l],
                        preferred_element_type=f32) + bbd_ref[l]        # (B_pad, G*4H)
            hs = [gates_t0(g[:, s * H4:(s + 1) * H4]) for s in range(G)]
            for s in range(G):
                hstate[s][l] = hs[s]
            h_pack = jnp.concatenate(hs, axis=1).astype(bf16)           # (B_pad, G*H)
            c = jnp.dot(h_pack, wbd_ref[L + l],
                        preferred_element_type=f32) + bbd_ref[L + l]    # (B_pad, G*4H)
            for s in range(G):
                hh_pre[s][l] = c[:, s * H4:(s + 1) * H4]

        # Loss mask over the valid (batch, O) region (padded rows carry
        # bias-propagated garbage and must never enter the reduction).
        row = jax.lax.broadcasted_iota(jnp.int32, (B_pad, H), 0)
        col = jax.lax.broadcasted_iota(jnp.int32, (B_pad, H), 1)
        mask = ((row < batch) & (col < O)).astype(f32)
        loss_acc = jnp.zeros((B_pad, H), f32)

        fcw = wxc_ref[GL]                          # (H, 4H) bf16, cols >= O zero
        fcb = fcb_ref[...]                         # (1, 4H)  f32

        # ---- SERIAL chain: per stack, the second time step through all L
        #      layers.  The FC head is folded into the next stack's layer-0
        #      weights, so only G*L (+1 final FC) dots are mutually dependent;
        #      the per-stack FC dot below only feeds the (off-chain) loss. -----
        cur = x_ref[1].astype(bf16)                # stack 0's second-step input
        out_full = None
        for s in range(G):
            for l in range(L):
                idx = s * L + l
                g = jnp.dot(cur, wxc_ref[idx],
                            preferred_element_type=f32) + hh_pre[s][l]
                cur = gates_t1(g, hstate[s][l]).astype(bf16)
            out_full = jnp.dot(cur, fcw, preferred_element_type=f32) + fcb
            target = x_ref[s + 2] if s < G - 1 else z_ref[...]
            diff = out_full[:, :H] - target
            loss_acc = loss_acc + mask * (diff * diff)

        out_ref[...] = out_full                    # lane-dense (B_pad, 4H) store
        loss_ref[0, 0] = jnp.sum(loss_acc) * f32(1.0 / (batch * O))

    vmem = pl.BlockSpec(memory_space=pltpu.MemorySpace.VMEM)
    smem = pl.BlockSpec(memory_space=pltpu.MemorySpace.SMEM)
    call = pl.pallas_call(
        kernel,
        out_shape=(
            jax.ShapeDtypeStruct((B_pad, H4), jnp.float32),   # padded FC output
            jax.ShapeDtypeStruct((1, 1), jnp.float32),        # scalar loss
        ),
        in_specs=[vmem] * 7,
        out_specs=(vmem, smem),
    )

    # t0 inputs of the G stacks: x columns [0, 2, 3, ..., G]
    t0_cols = [0] + list(range(2, G + 1))

    @jax.jit
    def forward(x, z, wbd, bbd, wxc, fcb):
        # Pad batch to the 8-sublane width and layer-0 features to `hidden`;
        # time-major layout so the kernel reads one (B_pad, H) tile per time index.
        x_pad = jnp.zeros((seq, B_pad, H), jnp.float32)
        x_pad = x_pad.at[:, :batch, :input_size].set(
            jnp.transpose(x.astype(jnp.float32), (1, 0, 2)))
        x0cat = jnp.concatenate([x_pad[c] for c in t0_cols],
                                axis=1).astype(jnp.bfloat16)        # (B_pad, G*H)
        z_pad = jnp.zeros((B_pad, H), jnp.float32).at[:batch, :O].set(
            z.astype(jnp.float32))
        out_pad, loss = call(x_pad, x0cat, z_pad, wbd, bbd, wxc, fcb)
        return out_pad[:batch, :O], loss[0, 0]

    return forward


# ----------------------------------------------------------------------------
# Deterministic parameter construction (synthetic, PyTorch-style uniform init)
# ----------------------------------------------------------------------------
def init_params(key, input_size, hidden, num_layers, output_size, num_gru):
    G = num_gru - 1
    bound = 1.0 / math.sqrt(hidden)

    def uni(k, shape):
        return jax.random.uniform(k, shape, jnp.float32, -bound, bound)

    stacks = []
    for _ in range(G):
        layers = []
        for l in range(num_layers):
            in_dim = input_size if l == 0 else hidden
            key, k1, k2, k3, k4 = jax.random.split(key, 5)
            layers.append((uni(k1, (3 * hidden, in_dim)),    # nn.GRU weight_ih
                           uni(k2, (3 * hidden, hidden)),    # nn.GRU weight_hh
                           uni(k3, (3 * hidden,)),           # bias_ih
                           uni(k4, (3 * hidden,))))          # bias_hh
        stacks.append(layers)
    key, kw, kb = jax.random.split(key, 3)
    fc_w = uni(kw, (output_size, hidden))                    # nn.Linear weight
    fc_b = uni(kb, (output_size,))                           # nn.Linear bias
    return stacks, fc_w, fc_b, key


if __name__ == "__main__":
    # Small shapes consistent with the module: batch=4, seq=8, input=output=16,
    # hidden=32, num_layers=2, num_gru=5.
    B, S, I, H, L, O, NUM_GRU = 4, 8, 16, 32, 2, 16, 5

    key = jax.random.PRNGKey(0)
    gru_params, fc_w, fc_b, key = init_params(key, I, H, L, O, NUM_GRU)

    key, kx, kz = jax.random.split(key, 3)
    x = jax.random.normal(kx, (B, S, I), jnp.float32)
    z = jax.random.normal(kz, (B, O), jnp.float32)

    wbd, bbd, wxc, fcb = pack_params(gru_params, fc_w, fc_b, I, H, O, L)

    forward = make_gru_model(B, S, I, H, L, O, NUM_GRU)
    out, loss = forward(x, z, wbd, bbd, wxc, fcb)
    out, loss = jax.block_until_ready((out, loss))

    # Pure-JAX f32 reference (PyTorch-layout math).  Tolerance accounts for
    # bf16 MXU operands and the FC-fold reassociation (estimated error << 1e-2).
    ref_out, ref_loss = jax.jit(
        functools.partial(_model_forward_ref, hidden=H, num_gru=NUM_GRU)
    )(x, z, gru_params, fc_w, fc_b)
    assert out.shape == (B, O)
    assert jnp.allclose(out, ref_out, rtol=3e-2, atol=3e-2), (
        float(jnp.max(jnp.abs(out - ref_out))))
    assert jnp.allclose(loss, ref_loss, rtol=3e-2, atol=3e-2), (
        float(loss), float(ref_loss))

    print("KERNEL_OK")
</pallas_src>

<mosaic_0001>
module attributes {stable_mosaic.version = 11 : i64} {
  func.func @kernel(%arg0: memref<8x8x32xf32, #tpu.memory_space<vmem>>, %arg1: memref<8x128xbf16, #tpu.memory_space<vmem>>, %arg2: memref<8x32xf32, #tpu.memory_space<vmem>>, %arg3: memref<4x128x512xbf16, #tpu.memory_space<vmem>>, %arg4: memref<4x1x512xf32, #tpu.memory_space<vmem>>, %arg5: memref<9x32x128xbf16, #tpu.memory_space<vmem>>, %arg6: memref<1x128xf32, #tpu.memory_space<vmem>>, %arg7: memref<8x128xf32, #tpu.memory_space<vmem>>, %arg8: memref<1x1xf32, #tpu.memory_space<smem>>) attributes {dimension_semantics = [], scalar_prefetch = 0 : i64, scratch_operands = 0 : i64, tpu.core_type = #tpu.core_type<tc>} {
    %c0 = arith.constant 0 : index
    %c0_0 = arith.constant 0 : index
    %0 = vector.load %arg1[%c0, %c0_0] : memref<8x128xbf16, #tpu.memory_space<vmem>>, vector<8x128xbf16>
    %c0_1 = arith.constant 0 : index
    %c0_2 = arith.constant 0 : index
    %c0_3 = arith.constant 0 : index
    %1 = vector.load %arg3[%c0_1, %c0_2, %c0_3] : memref<4x128x512xbf16, #tpu.memory_space<vmem>>, vector<1x128x512xbf16>
    %2 = vector.shape_cast %1 : vector<1x128x512xbf16> to vector<128x512xbf16>
    %cst = arith.constant dense<0.000000e+00> : vector<8x512xf32>
    %3 = tpu.matmul %0, %2, %cst {dimension_numbers = #tpu.dot_dimension_numbers<[1], [0], [0], [1], [0, 0, 1, 1], [], []>} : vector<8x128xbf16>, vector<128x512xbf16>, vector<8x512xf32> -> vector<8x512xf32>
    %c0_4 = arith.constant 0 : index
    %c0_5 = arith.constant 0 : index
    %c0_6 = arith.constant 0 : index
    %4 = vector.load %arg4[%c0_4, %c0_5, %c0_6] : memref<4x1x512xf32, #tpu.memory_space<vmem>>, vector<1x1x512xf32>
    %5 = vector.shape_cast %4 : vector<1x1x512xf32> to vector<1x512xf32>
    %6 = vector.broadcast %5 : vector<1x512xf32> to vector<8x512xf32>
    %7 = arith.addf %3, %6 : vector<8x512xf32>
    %8 = vector.extract_strided_slice %7 {offsets = [0, 0], sizes = [8, 128], strides = [1, 1]} : vector<8x512xf32> to vector<8x128xf32>
    %9 = vector.extract_strided_slice %8 {offsets = [0, 0], sizes = [8, 64], strides = [1, 1]} : vector<8x128xf32> to vector<8x64xf32>
    %10 = arith.negf %9 : vector<8x64xf32>
    %11 = math.exp %10 : vector<8x64xf32>
    %cst_7 = arith.constant 1.000000e+00 : f32
    %12 = vector.broadcast %cst_7 : f32 to vector<8x64xf32>
    %13 = arith.addf %12, %11 : vector<8x64xf32>
    %14 = arith.divf %12, %13 : vector<8x64xf32>
    %15 = vector.extract_strided_slice %14 {offsets = [0, 0], sizes = [8, 32], strides = [1, 1]} : vector<8x64xf32> to vector<8x32xf32>
    %16 = vector.extract_strided_slice %14 {offsets = [0, 32], sizes = [8, 32], strides = [1, 1]} : vector<8x64xf32> to vector<8x32xf32>
    %17 = vector.extract_strided_slice %8 {offsets = [0, 64], sizes = [8, 32], strides = [1, 1]} : vector<8x128xf32> to vector<8x32xf32>
    %18 = vector.extract_strided_slice %8 {offsets = [0, 96], sizes = [8, 32], strides = [1, 1]} : vector<8x128xf32> to vector<8x32xf32>
    %19 = arith.mulf %15, %18 : vector<8x32xf32>
    %20 = arith.addf %17, %19 : vector<8x32xf32>
    %21 = math.tanh %20 : vector<8x32xf32>
    %22 = arith.mulf %16, %21 : vector<8x32xf32>
    %23 = arith.subf %21, %22 : vector<8x32xf32>
    %24 = vector.extract_strided_slice %7 {offsets = [0, 128], sizes = [8, 128], strides = [1, 1]} : vector<8x512xf32> to vector<8x128xf32>
    %25 = vector.extract_strided_slice %24 {offsets = [0, 0], sizes = [8, 64], strides = [1, 1]} : vector<8x128xf32> to vector<8x64xf32>
    %26 = arith.negf %25 : vector<8x64xf32>
    %27 = math.exp %26 : vector<8x64xf32>
    %cst_8 = arith.constant 1.000000e+00 : f32
    %28 = vector.broadcast %cst_8 : f32 to vector<8x64xf32>
    %29 = arith.addf %28, %27 : vector<8x64xf32>
    %30 = arith.divf %28, %29 : vector<8x64xf32>
    %31 = vector.extract_strided_slice %30 {offsets = [0, 0], sizes = [8, 32], strides = [1, 1]} : vector<8x64xf32> to vector<8x32xf32>
    %32 = vector.extract_strided_slice %30 {offsets = [0, 32], sizes = [8, 32], strides = [1, 1]} : vector<8x64xf32> to vector<8x32xf32>
    %33 = vector.extract_strided_slice %24 {offsets = [0, 64], sizes = [8, 32], strides = [1, 1]} : vector<8x128xf32> to vector<8x32xf32>
    %34 = vector.extract_strided_slice %24 {offsets = [0, 96], sizes = [8, 32], strides = [1, 1]} : vector<8x128xf32> to vector<8x32xf32>
    %35 = arith.mulf %31, %34 : vector<8x32xf32>
    %36 = arith.addf %33, %35 : vector<8x32xf32>
    %37 = math.tanh %36 : vector<8x32xf32>
    %38 = arith.mulf %32, %37 : vector<8x32xf32>
    %39 = arith.subf %37, %38 : vector<8x32xf32>
    %40 = vector.extract_strided_slice %7 {offsets = [0, 256], sizes = [8, 128], strides = [1, 1]} : vector<8x512xf32> to vector<8x128xf32>
    %41 = vector.extract_strided_slice %40 {offsets = [0, 0], sizes = [8, 64], strides = [1, 1]} : vector<8x128xf32> to vector<8x64xf32>
    %42 = arith.negf %41 : vector<8x64xf32>
    %43 = math.exp %42 : vector<8x64xf32>
    %cst_9 = arith.constant 1.000000e+00 : f32
    %44 = vector.broadcast %cst_9 : f32 to vector<8x64xf32>
    %45 = arith.addf %44, %43 : vector<8x64xf32>
    %46 = arith.divf %44, %45 : vector<8x64xf32>
    %47 = vector.extract_strided_slice %46 {offsets = [0, 0], sizes = [8, 32], strides = [1, 1]} : vector<8x64xf32> to vector<8x32xf32>
    %48 = vector.extract_strided_slice %46 {offsets = [0, 32], sizes = [8, 32], strides = [1, 1]} : vector<8x64xf32> to vector<8x32xf32>
    %49 = vector.extract_strided_slice %40 {offsets = [0, 64], sizes = [8, 32], strides = [1, 1]} : vector<8x128xf32> to vector<8x32xf32>
    %50 = vector.extract_strided_slice %40 {offsets = [0, 96], sizes = [8, 32], strides = [1, 1]} : vector<8x128xf32> to vector<8x32xf32>
    %51 = arith.mulf %47, %50 : vector<8x32xf32>
    %52 = arith.addf %49, %51 : vector<8x32xf32>
    %53 = math.tanh %52 : vector<8x32xf32>
    %54 = arith.mulf %48, %53 : vector<8x32xf32>
    %55 = arith.subf %53, %54 : vector<8x32xf32>
    %56 = vector.extract_strided_slice %7 {offsets = [0, 384], sizes = [8, 128], strides = [1, 1]} : vector<8x512xf32> to vector<8x128xf32>
    %57 = vector.extract_strided_slice %56 {offsets = [0, 0], sizes = [8, 64], strides = [1, 1]} : vector<8x128xf32> to vector<8x64xf32>
    %58 = arith.negf %57 : vector<8x64xf32>
    %59 = math.exp %58 : vector<8x64xf32>
    %cst_10 = arith.constant 1.000000e+00 : f32
    %60 = vector.broadcast %cst_10 : f32 to vector<8x64xf32>
    %61 = arith.addf %60, %59 : vector<8x64xf32>
    %62 = arith.divf %60, %61 : vector<8x64xf32>
    %63 = vector.extract_strided_slice %62 {offsets = [0, 0], sizes = [8, 32], strides = [1, 1]} : vector<8x64xf32> to vector<8x32xf32>
    %64 = vector.extract_strided_slice %62 {offsets = [0, 32], sizes = [8, 32], strides = [1, 1]} : vector<8x64xf32> to vector<8x32xf32>
    %65 = vector.extract_strided_slice %56 {offsets = [0, 64], sizes = [8, 32], strides = [1, 1]} : vector<8x128xf32> to vector<8x32xf32>
    %66 = vector.extract_strided_slice %56 {offsets = [0, 96], sizes = [8, 32], strides = [1, 1]} : vector<8x128xf32> to vector<8x32xf32>
    %67 = arith.mulf %63, %66 : vector<8x32xf32>
    %68 = arith.addf %65, %67 : vector<8x32xf32>
    %69 = math.tanh %68 : vector<8x32xf32>
    %70 = arith.mulf %64, %69 : vector<8x32xf32>
    %71 = arith.subf %69, %70 : vector<8x32xf32>
    %72 = tpu.concatenate %23, %39, %55, %71 in 1 : vector<8x32xf32>, vector<8x32xf32>, vector<8x32xf32>, vector<8x32xf32> -> vector<8x128xf32>
    %73 = arith.truncf %72 : vector<8x128xf32> to vector<8x128xbf16>
    %c2 = arith.constant 2 : index
    %c0_11 = arith.constant 0 : index
    %c0_12 = arith.constant 0 : index
    %74 = vector.load %arg3[%c2, %c0_11, %c0_12] : memref<4x128x512xbf16, #tpu.memory_space<vmem>>, vector<1x128x512xbf16>
    %75 = vector.shape_cast %74 : vector<1x128x512xbf16> to vector<128x512xbf16>
    %cst_13 = arith.constant dense<0.000000e+00> : vector<8x512xf32>
    %76 = tpu.matmul %73, %75, %cst_13 {dimension_numbers = #tpu.dot_dimension_numbers<[1], [0], [0], [1], [0, 0, 1, 1], [], []>} : vector<8x128xbf16>, vector<128x512xbf16>, vector<8x512xf32> -> vector<8x512xf32>
    %c2_14 = arith.constant 2 : index
    %c0_15 = arith.constant 0 : index
    %c0_16 = arith.constant 0 : index
    %77 = vector.load %arg4[%c2_14, %c0_15, %c0_16] : memref<4x1x512xf32, #tpu.memory_space<vmem>>, vector<1x1x512xf32>
    %78 = vector.shape_cast %77 : vector<1x1x512xf32> to vector<1x512xf32>
    %79 = vector.broadcast %78 : vector<1x512xf32> to vector<8x512xf32>
    %80 = arith.addf %76, %79 : vector<8x512xf32>
    %81 = vector.extract_strided_slice %80 {offsets = [0, 0], sizes = [8, 128], strides = [1, 1]} : vector<8x512xf32> to vector<8x128xf32>
    %82 = vector.extract_strided_slice %80 {offsets = [0, 128], sizes = [8, 128], strides = [1, 1]} : vector<8x512xf32> to vector<8x128xf32>
    %83 = vector.extract_strided_slice %80 {offsets = [0, 256], sizes = [8, 128], strides = [1, 1]} : vector<8x512xf32> to vector<8x128xf32>
    %84 = vector.extract_strided_slice %80 {offsets = [0, 384], sizes = [8, 128], strides = [1, 1]} : vector<8x512xf32> to vector<8x128xf32>
    %c1 = arith.constant 1 : index
    %c0_17 = arith.constant 0 : index
    %c0_18 = arith.constant 0 : index
    %85 = vector.load %arg3[%c1, %c0_17, %c0_18] : memref<4x128x512xbf16, #tpu.memory_space<vmem>>, vector<1x128x512xbf16>
    %86 = vector.shape_cast %85 : vector<1x128x512xbf16> to vector<128x512xbf16>
    %cst_19 = arith.constant dense<0.000000e+00> : vector<8x512xf32>
    %87 = tpu.matmul %73, %86, %cst_19 {dimension_numbers = #tpu.dot_dimension_numbers<[1], [0], [0], [1], [0, 0, 1, 1], [], []>} : vector<8x128xbf16>, vector<128x512xbf16>, vector<8x512xf32> -> vector<8x512xf32>
    %c1_20 = arith.constant 1 : index
    %c0_21 = arith.constant 0 : index
    %c0_22 = arith.constant 0 : index
    %88 = vector.load %arg4[%c1_20, %c0_21, %c0_22] : memref<4x1x512xf32, #tpu.memory_space<vmem>>, vector<1x1x512xf32>
    %89 = vector.shape_cast %88 : vector<1x1x512xf32> to vector<1x512xf32>
    %90 = vector.broadcast %89 : vector<1x512xf32> to vector<8x512xf32>
    %91 = arith.addf %87, %90 : vector<8x512xf32>
    %92 = vector.extract_strided_slice %91 {offsets = [0, 0], sizes = [8, 128], strides = [1, 1]} : vector<8x512xf32> to vector<8x128xf32>
    %93 = vector.extract_strided_slice %92 {offsets = [0, 0], sizes = [8, 64], strides = [1, 1]} : vector<8x128xf32> to vector<8x64xf32>
    %94 = arith.negf %93 : vector<8x64xf32>
    %95 = math.exp %94 : vector<8x64xf32>
    %cst_23 = arith.constant 1.000000e+00 : f32
    %96 = vector.broadcast %cst_23 : f32 to vector<8x64xf32>
    %97 = arith.addf %96, %95 : vector<8x64xf32>
    %98 = arith.divf %96, %97 : vector<8x64xf32>
    %99 = vector.extract_strided_slice %98 {offsets = [0, 0], sizes = [8, 32], strides = [1, 1]} : vector<8x64xf32> to vector<8x32xf32>
    %100 = vector.extract_strided_slice %98 {offsets = [0, 32], sizes = [8, 32], strides = [1, 1]} : vector<8x64xf32> to vector<8x32xf32>
    %101 = vector.extract_strided_slice %92 {offsets = [0, 64], sizes = [8, 32], strides = [1, 1]} : vector<8x128xf32> to vector<8x32xf32>
    %102 = vector.extract_strided_slice %92 {offsets = [0, 96], sizes = [8, 32], strides = [1, 1]} : vector<8x128xf32> to vector<8x32xf32>
    %103 = arith.mulf %99, %102 : vector<8x32xf32>
    %104 = arith.addf %101, %103 : vector<8x32xf32>
    %105 = math.tanh %104 : vector<8x32xf32>
    %106 = arith.mulf %100, %105 : vector<8x32xf32>
    %107 = arith.subf %105, %106 : vector<8x32xf32>
    %108 = vector.extract_strided_slice %91 {offsets = [0, 128], sizes = [8, 128], strides = [1, 1]} : vector<8x512xf32> to vector<8x128xf32>
    %109 = vector.extract_strided_slice %108 {offsets = [0, 0], sizes = [8, 64], strides = [1, 1]} : vector<8x128xf32> to vector<8x64xf32>
    %110 = arith.negf %109 : vector<8x64xf32>
    %111 = math.exp %110 : vector<8x64xf32>
    %cst_24 = arith.constant 1.000000e+00 : f32
    %112 = vector.broadcast %cst_24 : f32 to vector<8x64xf32>
    %113 = arith.addf %112, %111 : vector<8x64xf32>
    %114 = arith.divf %112, %113 : vector<8x64xf32>
    %115 = vector.extract_strided_slice %114 {offsets = [0, 0], sizes = [8, 32], strides = [1, 1]} : vector<8x64xf32> to vector<8x32xf32>
    %116 = vector.extract_strided_slice %114 {offsets = [0, 32], sizes = [8, 32], strides = [1, 1]} : vector<8x64xf32> to vector<8x32xf32>
    %117 = vector.extract_strided_slice %108 {offsets = [0, 64], sizes = [8, 32], strides = [1, 1]} : vector<8x128xf32> to vector<8x32xf32>
    %118 = vector.extract_strided_slice %108 {offsets = [0, 96], sizes = [8, 32], strides = [1, 1]} : vector<8x128xf32> to vector<8x32xf32>
    %119 = arith.mulf %115, %118 : vector<8x32xf32>
    %120 = arith.addf %117, %119 : vector<8x32xf32>
    %121 = math.tanh %120 : vector<8x32xf32>
    %122 = arith.mulf %116, %121 : vector<8x32xf32>
    %123 = arith.subf %121, %122 : vector<8x32xf32>
    %124 = vector.extract_strided_slice %91 {offsets = [0, 256], sizes = [8, 128], strides = [1, 1]} : vector<8x512xf32> to vector<8x128xf32>
    %125 = vector.extract_strided_slice %124 {offsets = [0, 0], sizes = [8, 64], strides = [1, 1]} : vector<8x128xf32> to vector<8x64xf32>
    %126 = arith.negf %125 : vector<8x64xf32>
    %127 = math.exp %126 : vector<8x64xf32>
    %cst_25 = arith.constant 1.000000e+00 : f32
    %128 = vector.broadcast %cst_25 : f32 to vector<8x64xf32>
    %129 = arith.addf %128, %127 : vector<8x64xf32>
    %130 = arith.divf %128, %129 : vector<8x64xf32>
    %131 = vector.extract_strided_slice %130 {offsets = [0, 0], sizes = [8, 32], strides = [1, 1]} : vector<8x64xf32> to vector<8x32xf32>
    %132 = vector.extract_strided_slice %130 {offsets = [0, 32], sizes = [8, 32], strides = [1, 1]} : vector<8x64xf32> to vector<8x32xf32>
    %133 = vector.extract_strided_slice %124 {offsets = [0, 64], sizes = [8, 32], strides = [1, 1]} : vector<8x128xf32> to vector<8x32xf32>
    %134 = vector.extract_strided_slice %124 {offsets = [0, 96], sizes = [8, 32], strides = [1, 1]} : vector<8x128xf32> to vector<8x32xf32>
    %135 = arith.mulf %131, %134 : vector<8x32xf32>
    %136 = arith.addf %133, %135 : vector<8x32xf32>
    %137 = math.tanh %136 : vector<8x32xf32>
    %138 = arith.mulf %132, %137 : vector<8x32xf32>
    %139 = arith.subf %137, %138 : vector<8x32xf32>
    %140 = vector.extract_strided_slice %91 {offsets = [0, 384], sizes = [8, 128], strides = [1, 1]} : vector<8x512xf32> to vector<8x128xf32>
    %141 = vector.extract_strided_slice %140 {offsets = [0, 0], sizes = [8, 64], strides = [1, 1]} : vector<8x128xf32> to vector<8x64xf32>
    %142 = arith.negf %141 : vector<8x64xf32>
    %143 = math.exp %142 : vector<8x64xf32>
    %cst_26 = arith.constant 1.000000e+00 : f32
    %144 = vector.broadcast %cst_26 : f32 to vector<8x64xf32>
    %145 = arith.addf %144, %143 : vector<8x64xf32>
    %146 = arith.divf %144, %145 : vector<8x64xf32>
    %147 = vector.extract_strided_slice %146 {offsets = [0, 0], sizes = [8, 32], strides = [1, 1]} : vector<8x64xf32> to vector<8x32xf32>
    %148 = vector.extract_strided_slice %146 {offsets = [0, 32], sizes = [8, 32], strides = [1, 1]} : vector<8x64xf32> to vector<8x32xf32>
    %149 = vector.extract_strided_slice %140 {offsets = [0, 64], sizes = [8, 32], strides = [1, 1]} : vector<8x128xf32> to vector<8x32xf32>
    %150 = vector.extract_strided_slice %140 {offsets = [0, 96], sizes = [8, 32], strides = [1, 1]} : vector<8x128xf32> to vector<8x32xf32>
    %151 = arith.mulf %147, %150 : vector<8x32xf32>
    %152 = arith.addf %149, %151 : vector<8x32xf32>
    %153 = math.tanh %152 : vector<8x32xf32>
    %154 = arith.mulf %148, %153 : vector<8x32xf32>
    %155 = arith.subf %153, %154 : vector<8x32xf32>
    %156 = tpu.concatenate %107, %123, %139, %155 in 1 : vector<8x32xf32>, vector<8x32xf32>, vector<8x32xf32>, vector<8x32xf32> -> vector<8x128xf32>
    %157 = arith.truncf %156 : vector<8x128xf32> to vector<8x128xbf16>
    %c3 = arith.constant 3 : index
    %c0_27 = arith.constant 0 : index
    %c0_28 = arith.constant 0 : index
    %158 = vector.load %arg3[%c3, %c0_27, %c0_28] : memref<4x128x512xbf16, #tpu.memory_space<vmem>>, vector<1x128x512xbf16>
    %159 = vector.shape_cast %158 : vector<1x128x512xbf16> to vector<128x512xbf16>
    %cst_29 = arith.constant dense<0.000000e+00> : vector<8x512xf32>
    %160 = tpu.matmul %157, %159, %cst_29 {dimension_numbers = #tpu.dot_dimension_numbers<[1], [0], [0], [1], [0, 0, 1, 1], [], []>} : vector<8x128xbf16>, vector<128x512xbf16>, vector<8x512xf32> -> vector<8x512xf32>
    %c3_30 = arith.constant 3 : index
    %c0_31 = arith.constant 0 : index
    %c0_32 = arith.constant 0 : index
    %161 = vector.load %arg4[%c3_30, %c0_31, %c0_32] : memref<4x1x512xf32, #tpu.memory_space<vmem>>, vector<1x1x512xf32>
    %162 = vector.shape_cast %161 : vector<1x1x512xf32> to vector<1x512xf32>
    %163 = vector.broadcast %162 : vector<1x512xf32> to vector<8x512xf32>
    %164 = arith.addf %160, %163 : vector<8x512xf32>
    %165 = vector.extract_strided_slice %164 {offsets = [0, 0], sizes = [8, 128], strides = [1, 1]} : vector<8x512xf32> to vector<8x128xf32>
    %166 = vector.extract_strided_slice %164 {offsets = [0, 128], sizes = [8, 128], strides = [1, 1]} : vector<8x512xf32> to vector<8x128xf32>
    %167 = vector.extract_strided_slice %164 {offsets = [0, 256], sizes = [8, 128], strides = [1, 1]} : vector<8x512xf32> to vector<8x128xf32>
    %168 = vector.extract_strided_slice %164 {offsets = [0, 384], sizes = [8, 128], strides = [1, 1]} : vector<8x512xf32> to vector<8x128xf32>
    %169 = tpu.iota {dimensions = array<i32: 0>} : vector<8x32xi32>
    %170 = tpu.iota {dimensions = array<i32: 1>} : vector<8x32xi32>
    %c4_i32 = arith.constant 4 : i32
    %171 = vector.broadcast %c4_i32 : i32 to vector<8x32xi32>
    %172 = arith.cmpi slt, %169, %171 : vector<8x32xi32>
    %c16_i32 = arith.constant 16 : i32
    %173 = vector.broadcast %c16_i32 : i32 to vector<8x32xi32>
    %174 = arith.cmpi slt, %170, %173 : vector<8x32xi32>
    %175 = arith.andi %172, %174 : vector<8x32xi1>
    %176 = arith.extui %175 : vector<8x32xi1> to vector<8x32xi32>
    %177 = arith.sitofp %176 : vector<8x32xi32> to vector<8x32xf32>
    %cst_33 = arith.constant 0.000000e+00 : f32
    %178 = vector.broadcast %cst_33 : f32 to vector<8x32xf32>
    %c8 = arith.constant 8 : index
    %c0_34 = arith.constant 0 : index
    %c0_35 = arith.constant 0 : index
    %179 = vector.load %arg5[%c8, %c0_34, %c0_35] : memref<9x32x128xbf16, #tpu.memory_space<vmem>>, vector<1x32x128xbf16>
    %180 = vector.shape_cast %179 : vector<1x32x128xbf16> to vector<32x128xbf16>
    %c0_36 = arith.constant 0 : index
    %c0_37 = arith.constant 0 : index
    %181 = vector.load %arg6[%c0_36, %c0_37] : memref<1x128xf32, #tpu.memory_space<vmem>>, vector<1x128xf32>
    %c1_38 = arith.constant 1 : index
    %c0_39 = arith.constant 0 : index
    %c0_40 = arith.constant 0 : index
    %182 = vector.load %arg0[%c1_38, %c0_39, %c0_40] : memref<8x8x32xf32, #tpu.memory_space<vmem>>, vector<1x8x32xf32>
    %183 = vector.shape_cast %182 : vector<1x8x32xf32> to vector<8x32xf32>
    %184 = arith.truncf %183 : vector<8x32xf32> to vector<8x32xbf16>
    %c0_41 = arith.constant 0 : index
    %c0_42 = arith.constant 0 : index
    %c0_43 = arith.constant 0 : index
    %185 = vector.load %arg5[%c0_41, %c0_42, %c0_43] : memref<9x32x128xbf16, #tpu.memory_space<vmem>>, vector<1x32x128xbf16>
    %186 = vector.shape_cast %185 : vector<1x32x128xbf16> to vector<32x128xbf16>
    %cst_44 = arith.constant dense<0.000000e+00> : vector<8x128xf32>
    %187 = tpu.matmul %184, %186, %cst_44 {dimension_numbers = #tpu.dot_dimension_numbers<[1], [0], [0], [1], [0, 0, 1, 1], [], []>} : vector<8x32xbf16>, vector<32x128xbf16>, vector<8x128xf32> -> vector<8x128xf32>
    %188 = arith.addf %187, %81 : vector<8x128xf32>
    %189 = vector.extract_strided_slice %188 {offsets = [0, 0], sizes = [8, 64], strides = [1, 1]} : vector<8x128xf32> to vector<8x64xf32>
    %190 = arith.negf %189 : vector<8x64xf32>
    %191 = math.exp %190 : vector<8x64xf32>
    %cst_45 = arith.constant 1.000000e+00 : f32
    %192 = vector.broadcast %cst_45 : f32 to vector<8x64xf32>
    %193 = arith.addf %192, %191 : vector<8x64xf32>
    %194 = arith.divf %192, %193 : vector<8x64xf32>
    %195 = vector.extract_strided_slice %194 {offsets = [0, 0], sizes = [8, 32], strides = [1, 1]} : vector<8x64xf32> to vector<8x32xf32>
    %196 = vector.extract_strided_slice %194 {offsets = [0, 32], sizes = [8, 32], strides = [1, 1]} : vector<8x64xf32> to vector<8x32xf32>
    %197 = vector.extract_strided_slice %188 {offsets = [0, 64], sizes = [8, 32], strides = [1, 1]} : vector<8x128xf32> to vector<8x32xf32>
    %198 = vector.extract_strided_slice %188 {offsets = [0, 96], sizes = [8, 32], strides = [1, 1]} : vector<8x128xf32> to vector<8x32xf32>
    %199 = arith.mulf %195, %198 : vector<8x32xf32>
    %200 = arith.addf %197, %199 : vector<8x32xf32>
    %201 = math.tanh %200 : vector<8x32xf32>
    %202 = arith.subf %23, %201 : vector<8x32xf32>
    %203 = arith.mulf %196, %202 : vector<8x32xf32>
    %204 = arith.addf %201, %203 : vector<8x32xf32>
    %205 = arith.truncf %204 : vector<8x32xf32> to vector<8x32xbf16>
    %c1_46 = arith.constant 1 : index
    %c0_47 = arith.constant 0 : index
    %c0_48 = arith.constant 0 : index
    %206 = vector.load %arg5[%c1_46, %c0_47, %c0_48] : memref<9x32x128xbf16, #tpu.memory_space<vmem>>, vector<1x32x128xbf16>
    %207 = vector.shape_cast %206 : vector<1x32x128xbf16> to vector<32x128xbf16>
    %cst_49 = arith.constant dense<0.000000e+00> : vector<8x128xf32>
    %208 = tpu.matmul %205, %207, %cst_49 {dimension_numbers = #tpu.dot_dimension_numbers<[1], [0], [0], [1], [0, 0, 1, 1], [], []>} : vector<8x32xbf16>, vector<32x128xbf16>, vector<8x128xf32> -> vector<8x128xf32>
    %209 = arith.addf %208, %165 : vector<8x128xf32>
    %210 = vector.extract_strided_slice %209 {offsets = [0, 0], sizes = [8, 64], strides = [1, 1]} : vector<8x128xf32> to vector<8x64xf32>
    %211 = arith.negf %210 : vector<8x64xf32>
    %212 = math.exp %211 : vector<8x64xf32>
    %cst_50 = arith.constant 1.000000e+00 : f32
    %213 = vector.broadcast %cst_50 : f32 to vector<8x64xf32>
    %214 = arith.addf %213, %212 : vector<8x64xf32>
    %215 = arith.divf %213, %214 : vector<8x64xf32>
    %216 = vector.extract_strided_slice %215 {offsets = [0, 0], sizes = [8, 32], strides = [1, 1]} : vector<8x64xf32> to vector<8x32xf32>
    %217 = vector.extract_strided_slice %215 {offsets = [0, 32], sizes = [8, 32], strides = [1, 1]} : vector<8x64xf32> to vector<8x32xf32>
    %218 = vector.extract_strided_slice %209 {offsets = [0, 64], sizes = [8, 32], strides = [1, 1]} : vector<8x128xf32> to vector<8x32xf32>
    %219 = vector.extract_strided_slice %209 {offsets = [0, 96], sizes = [8, 32], strides = [1, 1]} : vector<8x128xf32> to vector<8x32xf32>
    %220 = arith.mulf %216, %219 : vector<8x32xf32>
    %221 = arith.addf %218, %220 : vector<8x32xf32>
    %222 = math.tanh %221 : vector<8x32xf32>
    %223 = arith.subf %107, %222 : vector<8x32xf32>
    %224 = arith.mulf %217, %223 : vector<8x32xf32>
    %225 = arith.addf %222, %224 : vector<8x32xf32>
    %226 = arith.truncf %225 : vector<8x32xf32> to vector<8x32xbf16>
    %cst_51 = arith.constant dense<0.000000e+00> : vector<8x128xf32>
    %227 = tpu.matmul %226, %180, %cst_51 {dimension_numbers = #tpu.dot_dimension_numbers<[1], [0], [0], [1], [0, 0, 1, 1], [], []>} : vector<8x32xbf16>, vector<32x128xbf16>, vector<8x128xf32> -> vector<8x128xf32>
    %228 = vector.broadcast %181 : vector<1x128xf32> to vector<8x128xf32>
    %229 = arith.addf %227, %228 : vector<8x128xf32>
    %c2_52 = arith.constant 2 : index
    %c0_53 = arith.constant 0 : index
    %c0_54 = arith.constant 0 : index
    %230 = vector.load %arg0[%c2_52, %c0_53, %c0_54] : memref<8x8x32xf32, #tpu.memory_space<vmem>>, vector<1x8x32xf32>
    %231 = vector.shape_cast %230 : vector<1x8x32xf32> to vector<8x32xf32>
    %232 = vector.extract_strided_slice %229 {offsets = [0, 0], sizes = [8, 32], strides = [1, 1]} : vector<8x128xf32> to vector<8x32xf32>
    %233 = arith.subf %232, %231 : vector<8x32xf32>
    %234 = arith.mulf %233, %233 : vector<8x32xf32>
    %235 = arith.mulf %177, %234 : vector<8x32xf32>
    %236 = arith.addf %178, %235 : vector<8x32xf32>
    %c2_55 = arith.constant 2 : index
    %c0_56 = arith.constant 0 : index
    %c0_57 = arith.constant 0 : index
    %237 = vector.load %arg5[%c2_55, %c0_56, %c0_57] : memref<9x32x128xbf16, #tpu.memory_space<vmem>>, vector<1x32x128xbf16>
    %238 = vector.shape_cast %237 : vector<1x32x128xbf16> to vector<32x128xbf16>
    %cst_58 = arith.constant dense<0.000000e+00> : vector<8x128xf32>
    %239 = tpu.matmul %226, %238, %cst_58 {dimension_numbers = #tpu.dot_dimension_numbers<[1], [0], [0], [1], [0, 0, 1, 1], [], []>} : vector<8x32xbf16>, vector<32x128xbf16>, vector<8x128xf32> -> vector<8x128xf32>
    %240 = arith.addf %239, %82 : vector<8x128xf32>
    %241 = vector.extract_strided_slice %240 {offsets = [0, 0], sizes = [8, 64], strides = [1, 1]} : vector<8x128xf32> to vector<8x64xf32>
    %242 = arith.negf %241 : vector<8x64xf32>
    %243 = math.exp %242 : vector<8x64xf32>
    %cst_59 = arith.constant 1.000000e+00 : f32
    %244 = vector.broadcast %cst_59 : f32 to vector<8x64xf32>
    %245 = arith.addf %244, %243 : vector<8x64xf32>
    %246 = arith.divf %244, %245 : vector<8x64xf32>
    %247 = vector.extract_strided_slice %246 {offsets = [0, 0], sizes = [8, 32], strides = [1, 1]} : vector<8x64xf32> to vector<8x32xf32>
    %248 = vector.extract_strided_slice %246 {offsets = [0, 32], sizes = [8, 32], strides = [1, 1]} : vector<8x64xf32> to vector<8x32xf32>
    %249 = vector.extract_strided_slice %240 {offsets = [0, 64], sizes = [8, 32], strides = [1, 1]} : vector<8x128xf32> to vector<8x32xf32>
    %250 = vector.extract_strided_slice %240 {offsets = [0, 96], sizes = [8, 32], strides = [1, 1]} : vector<8x128xf32> to vector<8x32xf32>
    %251 = arith.mulf %247, %250 : vector<8x32xf32>
    %252 = arith.addf %249, %251 : vector<8x32xf32>
    %253 = math.tanh %252 : vector<8x32xf32>
    %254 = arith.subf %39, %253 : vector<8x32xf32>
    %255 = arith.mulf %248, %254 : vector<8x32xf32>
    %256 = arith.addf %253, %255 : vector<8x32xf32>
    %257 = arith.truncf %256 : vector<8x32xf32> to vector<8x32xbf16>
    %c3_60 = arith.constant 3 : index
    %c0_61 = arith.constant 0 : index
    %c0_62 = arith.constant 0 : index
    %258 = vector.load %arg5[%c3_60, %c0_61, %c0_62] : memref<9x32x128xbf16, #tpu.memory_space<vmem>>, vector<1x32x128xbf16>
    %259 = vector.shape_cast %258 : vector<1x32x128xbf16> to vector<32x128xbf16>
    %cst_63 = arith.constant dense<0.000000e+00> : vector<8x128xf32>
    %260 = tpu.matmul %257, %259, %cst_63 {dimension_numbers = #tpu.dot_dimension_numbers<[1], [0], [0], [1], [0, 0, 1, 1], [], []>} : vector<8x32xbf16>, vector<32x128xbf16>, vector<8x128xf32> -> vector<8x128xf32>
    %261 = arith.addf %260, %166 : vector<8x128xf32>
    %262 = vector.extract_strided_slice %261 {offsets = [0, 0], sizes = [8, 64], strides = [1, 1]} : vector<8x128xf32> to vector<8x64xf32>
    %263 = arith.negf %262 : vector<8x64xf32>
    %264 = math.exp %263 : vector<8x64xf32>
    %cst_64 = arith.constant 1.000000e+00 : f32
    %265 = vector.broadcast %cst_64 : f32 to vector<8x64xf32>
    %266 = arith.addf %265, %264 : vector<8x64xf32>
    %267 = arith.divf %265, %266 : vector<8x64xf32>
    %268 = vector.extract_strided_slice %267 {offsets = [0, 0], sizes = [8, 32], strides = [1, 1]} : vector<8x64xf32> to vector<8x32xf32>
    %269 = vector.extract_strided_slice %267 {offsets = [0, 32], sizes = [8, 32], strides = [1, 1]} : vector<8x64xf32> to vector<8x32xf32>
    %270 = vector.extract_strided_slice %261 {offsets = [0, 64], sizes = [8, 32], strides = [1, 1]} : vector<8x128xf32> to vector<8x32xf32>
    %271 = vector.extract_strided_slice %261 {offsets = [0, 96], sizes = [8, 32], strides = [1, 1]} : vector<8x128xf32> to vector<8x32xf32>
    %272 = arith.mulf %268, %271 : vector<8x32xf32>
    %273 = arith.addf %270, %272 : vector<8x32xf32>
    %274 = math.tanh %273 : vector<8x32xf32>
    %275 = arith.subf %123, %274 : vector<8x32xf32>
    %276 = arith.mulf %269, %275 : vector<8x32xf32>
    %277 = arith.addf %274, %276 : vector<8x32xf32>
    %278 = arith.truncf %277 : vector<8x32xf32> to vector<8x32xbf16>
    %cst_65 = arith.constant dense<0.000000e+00> : vector<8x128xf32>
    %279 = tpu.matmul %278, %180, %cst_65 {dimension_numbers = #tpu.dot_dimension_numbers<[1], [0], [0], [1], [0, 0, 1, 1], [], []>} : vector<8x32xbf16>, vector<32x128xbf16>, vector<8x128xf32> -> vector<8x128xf32>
    %280 = vector.broadcast %181 : vector<1x128xf32> to vector<8x128xf32>
    %281 = arith.addf %279, %280 : vector<8x128xf32>
    %c3_66 = arith.constant 3 : index
    %c0_67 = arith.constant 0 : index
    %c0_68 = arith.constant 0 : index
    %282 = vector.load %arg0[%c3_66, %c0_67, %c0_68] : memref<8x8x32xf32, #tpu.memory_space<vmem>>, vector<1x8x32xf32>
    %283 = vector.shape_cast %282 : vector<1x8x32xf32> to vector<8x32xf32>
    %284 = vector.extract_strided_slice %281 {offsets = [0, 0], sizes = [8, 32], strides = [1, 1]} : vector<8x128xf32> to vector<8x32xf32>
    %285 = arith.subf %284, %283 : vector<8x32xf32>
    %286 = arith.mulf %285, %285 : vector<8x32xf32>
    %287 = arith.mulf %177, %286 : vector<8x32xf32>
    %288 = arith.addf %236, %287 : vector<8x32xf32>
    %c4 = arith.constant 4 : index
    %c0_69 = arith.constant 0 : index
    %c0_70 = arith.constant 0 : index
    %289 = vector.load %arg5[%c4, %c0_69, %c0_70] : memref<9x32x128xbf16, #tpu.memory_space<vmem>>, vector<1x32x128xbf16>
    %290 = vector.shape_cast %289 : vector<1x32x128xbf16> to vector<32x128xbf16>
    %cst_71 = arith.constant dense<0.000000e+00> : vector<8x128xf32>
    %291 = tpu.matmul %278, %290, %cst_71 {dimension_numbers = #tpu.dot_dimension_numbers<[1], [0], [0], [1], [0, 0, 1, 1], [], []>} : vector<8x32xbf16>, vector<32x128xbf16>, vector<8x128xf32> -> vector<8x128xf32>
    %292 = arith.addf %291, %83 : vector<8x128xf32>
    %293 = vector.extract_strided_slice %292 {offsets = [0, 0], sizes = [8, 64], strides = [1, 1]} : vector<8x128xf32> to vector<8x64xf32>
    %294 = arith.negf %293 : vector<8x64xf32>
    %295 = math.exp %294 : vector<8x64xf32>
    %cst_72 = arith.constant 1.000000e+00 : f32
    %296 = vector.broadcast %cst_72 : f32 to vector<8x64xf32>
    %297 = arith.addf %296, %295 : vector<8x64xf32>
    %298 = arith.divf %296, %297 : vector<8x64xf32>
    %299 = vector.extract_strided_slice %298 {offsets = [0, 0], sizes = [8, 32], strides = [1, 1]} : vector<8x64xf32> to vector<8x32xf32>
    %300 = vector.extract_strided_slice %298 {offsets = [0, 32], sizes = [8, 32], strides = [1, 1]} : vector<8x64xf32> to vector<8x32xf32>
    %301 = vector.extract_strided_slice %292 {offsets = [0, 64], sizes = [8, 32], strides = [1, 1]} : vector<8x128xf32> to vector<8x32xf32>
    %302 = vector.extract_strided_slice %292 {offsets = [0, 96], sizes = [8, 32], strides = [1, 1]} : vector<8x128xf32> to vector<8x32xf32>
    %303 = arith.mulf %299, %302 : vector<8x32xf32>
    %304 = arith.addf %301, %303 : vector<8x32xf32>
    %305 = math.tanh %304 : vector<8x32xf32>
    %306 = arith.subf %55, %305 : vector<8x32xf32>
    %307 = arith.mulf %300, %306 : vector<8x32xf32>
    %308 = arith.addf %305, %307 : vector<8x32xf32>
    %309 = arith.truncf %308 : vector<8x32xf32> to vector<8x32xbf16>
    %c5 = arith.constant 5 : index
    %c0_73 = arith.constant 0 : index
    %c0_74 = arith.constant 0 : index
    %310 = vector.load %arg5[%c5, %c0_73, %c0_74] : memref<9x32x128xbf16, #tpu.memory_space<vmem>>, vector<1x32x128xbf16>
    %311 = vector.shape_cast %310 : vector<1x32x128xbf16> to vector<32x128xbf16>
    %cst_75 = arith.constant dense<0.000000e+00> : vector<8x128xf32>
    %312 = tpu.matmul %309, %311, %cst_75 {dimension_numbers = #tpu.dot_dimension_numbers<[1], [0], [0], [1], [0, 0, 1, 1], [], []>} : vector<8x32xbf16>, vector<32x128xbf16>, vector<8x128xf32> -> vector<8x128xf32>
    %313 = arith.addf %312, %167 : vector<8x128xf32>
    %314 = vector.extract_strided_slice %313 {offsets = [0, 0], sizes = [8, 64], strides = [1, 1]} : vector<8x128xf32> to vector<8x64xf32>
    %315 = arith.negf %314 : vector<8x64xf32>
    %316 = math.exp %315 : vector<8x64xf32>
    %cst_76 = arith.constant 1.000000e+00 : f32
    %317 = vector.broadcast %cst_76 : f32 to vector<8x64xf32>
    %318 = arith.addf %317, %316 : vector<8x64xf32>
    %319 = arith.divf %317, %318 : vector<8x64xf32>
    %320 = vector.extract_strided_slice %319 {offsets = [0, 0], sizes = [8, 32], strides = [1, 1]} : vector<8x64xf32> to vector<8x32xf32>
    %321 = vector.extract_strided_slice %319 {offsets = [0, 32], sizes = [8, 32], strides = [1, 1]} : vector<8x64xf32> to vector<8x32xf32>
    %322 = vector.extract_strided_slice %313 {offsets = [0, 64], sizes = [8, 32], strides = [1, 1]} : vector<8x128xf32> to vector<8x32xf32>
    %323 = vector.extract_strided_slice %313 {offsets = [0, 96], sizes = [8, 32], strides = [1, 1]} : vector<8x128xf32> to vector<8x32xf32>
    %324 = arith.mulf %320, %323 : vector<8x32xf32>
    %325 = arith.addf %322, %324 : vector<8x32xf32>
    %326 = math.tanh %325 : vector<8x32xf32>
    %327 = arith.subf %139, %326 : vector<8x32xf32>
    %328 = arith.mulf %321, %327 : vector<8x32xf32>
    %329 = arith.addf %326, %328 : vector<8x32xf32>
    %330 = arith.truncf %329 : vector<8x32xf32> to vector<8x32xbf16>
    %cst_77 = arith.constant dense<0.000000e+00> : vector<8x128xf32>
    %331 = tpu.matmul %330, %180, %cst_77 {dimension_numbers = #tpu.dot_dimension_numbers<[1], [0], [0], [1], [0, 0, 1, 1], [], []>} : vector<8x32xbf16>, vector<32x128xbf16>, vector<8x128xf32> -> vector<8x128xf32>
    %332 = vector.broadcast %181 : vector<1x128xf32> to vector<8x128xf32>
    %333 = arith.addf %331, %332 : vector<8x128xf32>
    %c4_78 = arith.constant 4 : index
    %c0_79 = arith.constant 0 : index
    %c0_80 = arith.constant 0 : index
    %334 = vector.load %arg0[%c4_78, %c0_79, %c0_80] : memref<8x8x32xf32, #tpu.memory_space<vmem>>, vector<1x8x32xf32>
    %335 = vector.shape_cast %334 : vector<1x8x32xf32> to vector<8x32xf32>
    %336 = vector.extract_strided_slice %333 {offsets = [0, 0], sizes = [8, 32], strides = [1, 1]} : vector<8x128xf32> to vector<8x32xf32>
    %337 = arith.subf %336, %335 : vector<8x32xf32>
    %338 = arith.mulf %337, %337 : vector<8x32xf32>
    %339 = arith.mulf %177, %338 : vector<8x32xf32>
    %340 = arith.addf %288, %339 : vector<8x32xf32>
    %c6 = arith.constant 6 : index
    %c0_81 = arith.constant 0 : index
    %c0_82 = arith.constant 0 : index
    %341 = vector.load %arg5[%c6, %c0_81, %c0_82] : memref<9x32x128xbf16, #tpu.memory_space<vmem>>, vector<1x32x128xbf16>
    %342 = vector.shape_cast %341 : vector<1x32x128xbf16> to vector<32x128xbf16>
    %cst_83 = arith.constant dense<0.000000e+00> : vector<8x128xf32>
    %343 = tpu.matmul %330, %342, %cst_83 {dimension_numbers = #tpu.dot_dimension_numbers<[1], [0], [0], [1], [0, 0, 1, 1], [], []>} : vector<8x32xbf16>, vector<32x128xbf16>, vector<8x128xf32> -> vector<8x128xf32>
    %344 = arith.addf %343, %84 : vector<8x128xf32>
    %345 = vector.extract_strided_slice %344 {offsets = [0, 0], sizes = [8, 64], strides = [1, 1]} : vector<8x128xf32> to vector<8x64xf32>
    %346 = arith.negf %345 : vector<8x64xf32>
    %347 = math.exp %346 : vector<8x64xf32>
    %cst_84 = arith.constant 1.000000e+00 : f32
    %348 = vector.broadcast %cst_84 : f32 to vector<8x64xf32>
    %349 = arith.addf %348, %347 : vector<8x64xf32>
    %350 = arith.divf %348, %349 : vector<8x64xf32>
    %351 = vector.extract_strided_slice %350 {offsets = [0, 0], sizes = [8, 32], strides = [1, 1]} : vector<8x64xf32> to vector<8x32xf32>
    %352 = vector.extract_strided_slice %350 {offsets = [0, 32], sizes = [8, 32], strides = [1, 1]} : vector<8x64xf32> to vector<8x32xf32>
    %353 = vector.extract_strided_slice %344 {offsets = [0, 64], sizes = [8, 32], strides = [1, 1]} : vector<8x128xf32> to vector<8x32xf32>
    %354 = vector.extract_strided_slice %344 {offsets = [0, 96], sizes = [8, 32], strides = [1, 1]} : vector<8x128xf32> to vector<8x32xf32>
    %355 = arith.mulf %351, %354 : vector<8x32xf32>
    %356 = arith.addf %353, %355 : vector<8x32xf32>
    %357 = math.tanh %356 : vector<8x32xf32>
    %358 = arith.subf %71, %357 : vector<8x32xf32>
    %359 = arith.mulf %352, %358 : vector<8x32xf32>
    %360 = arith.addf %357, %359 : vector<8x32xf32>
    %361 = arith.truncf %360 : vector<8x32xf32> to vector<8x32xbf16>
    %c7 = arith.constant 7 : index
    %c0_85 = arith.constant 0 : index
    %c0_86 = arith.constant 0 : index
    %362 = vector.load %arg5[%c7, %c0_85, %c0_86] : memref<9x32x128xbf16, #tpu.memory_space<vmem>>, vector<1x32x128xbf16>
    %363 = vector.shape_cast %362 : vector<1x32x128xbf16> to vector<32x128xbf16>
    %cst_87 = arith.constant dense<0.000000e+00> : vector<8x128xf32>
    %364 = tpu.matmul %361, %363, %cst_87 {dimension_numbers = #tpu.dot_dimension_numbers<[1], [0], [0], [1], [0, 0, 1, 1], [], []>} : vector<8x32xbf16>, vector<32x128xbf16>, vector<8x128xf32> -> vector<8x128xf32>
    %365 = arith.addf %364, %168 : vector<8x128xf32>
    %366 = vector.extract_strided_slice %365 {offsets = [0, 0], sizes = [8, 64], strides = [1, 1]} : vector<8x128xf32> to vector<8x64xf32>
    %367 = arith.negf %366 : vector<8x64xf32>
    %368 = math.exp %367 : vector<8x64xf32>
    %cst_88 = arith.constant 1.000000e+00 : f32
    %369 = vector.broadcast %cst_88 : f32 to vector<8x64xf32>
    %370 = arith.addf %369, %368 : vector<8x64xf32>
    %371 = arith.divf %369, %370 : vector<8x64xf32>
    %372 = vector.extract_strided_slice %371 {offsets = [0, 0], sizes = [8, 32], strides = [1, 1]} : vector<8x64xf32> to vector<8x32xf32>
    %373 = vector.extract_strided_slice %371 {offsets = [0, 32], sizes = [8, 32], strides = [1, 1]} : vector<8x64xf32> to vector<8x32xf32>
    %374 = vector.extract_strided_slice %365 {offsets = [0, 64], sizes = [8, 32], strides = [1, 1]} : vector<8x128xf32> to vector<8x32xf32>
    %375 = vector.extract_strided_slice %365 {offsets = [0, 96], sizes = [8, 32], strides = [1, 1]} : vector<8x128xf32> to vector<8x32xf32>
    %376 = arith.mulf %372, %375 : vector<8x32xf32>
    %377 = arith.addf %374, %376 : vector<8x32xf32>
    %378 = math.tanh %377 : vector<8x32xf32>
    %379 = arith.subf %155, %378 : vector<8x32xf32>
    %380 = arith.mulf %373, %379 : vector<8x32xf32>
    %381 = arith.addf %378, %380 : vector<8x32xf32>
    %382 = arith.truncf %381 : vector<8x32xf32> to vector<8x32xbf16>
    %cst_89 = arith.constant dense<0.000000e+00> : vector<8x128xf32>
    %383 = tpu.matmul %382, %180, %cst_89 {dimension_numbers = #tpu.dot_dimension_numbers<[1], [0], [0], [1], [0, 0, 1, 1], [], []>} : vector<8x32xbf16>, vector<32x128xbf16>, vector<8x128xf32> -> vector<8x128xf32>
    %384 = vector.broadcast %181 : vector<1x128xf32> to vector<8x128xf32>
    %385 = arith.addf %383, %384 : vector<8x128xf32>
    %c0_90 = arith.constant 0 : index
    %c0_91 = arith.constant 0 : index
    %386 = vector.load %arg2[%c0_90, %c0_91] : memref<8x32xf32, #tpu.memory_space<vmem>>, vector<8x32xf32>
    %387 = vector.extract_strided_slice %385 {offsets = [0, 0], sizes = [8, 32], strides = [1, 1]} : vector<8x128xf32> to vector<8x32xf32>
    %388 = arith.subf %387, %386 : vector<8x32xf32>
    %389 = arith.mulf %388, %388 : vector<8x32xf32>
    %390 = arith.mulf %177, %389 : vector<8x32xf32>
    %391 = arith.addf %340, %390 : vector<8x32xf32>
    %c0_92 = arith.constant 0 : index
    %c0_93 = arith.constant 0 : index
    %392 = vector.load %arg7[%c0_92, %c0_93] : memref<8x128xf32, #tpu.memory_space<vmem>>, vector<8x128xf32>
    tpu.vector_store %arg7[%c0_92, %c0_93], %385 {strides = array<i32>} : memref<8x128xf32, #tpu.memory_space<vmem>>, vector<8x128xf32>,
    %393 = vector.shape_cast %391 : vector<8x32xf32> to vector<1x8x32xf32>
    %cst_94 = arith.constant dense<0.000000e+00> : vector<1xf32>
    %394 = vector.multi_reduction <add>, %393, %cst_94 [1, 2] : vector<1x8x32xf32> to vector<1xf32>
    %395 = vector.shape_cast %394 : vector<1xf32> to vector<1x1x1xf32>
    %396 = vector.extract %395[0, 0, 0] : f32 from vector<1x1x1xf32>
    %cst_95 = arith.constant 1.562500e-02 : f32
    %397 = arith.mulf %396, %cst_95 : f32
    %c0_96 = arith.constant 0 : index
    %c0_97 = arith.constant 0 : index
    %398 = memref.load %arg8[%c0_96, %c0_97] : memref<1x1xf32, #tpu.memory_space<smem>>
    memref.store %397, %arg8[%c0_96, %c0_97] : memref<1x1xf32, #tpu.memory_space<smem>>
    return
  }
}

</mosaic_0001>

<bundles_post_ra>
// kernel: forward.1
= control target key start
LH: loop header
LB: loop body
LE: loop exit
PB: predicated region body
PF: predicated region fallthrough
CT: control target
= control target key end

     0   :  { %14 = vsyncpa [#allocation3], 0  ;;  %s3558_s0 = inlined_call_operand.vmem [shape: f32[8,8,32], index: 0, kind: input, shape index: {}]   ;;  %s3559_s1 = inlined_call_operand.vmem [shape: bf16[8,128], index: 1, kind: input, shape index: {}]   ;;  %s3560_s2 = inlined_call_operand.vmem [shape: f32[8,32], index: 2, kind: input, shape index: {}]   ;;  %s3561_s3 = inlined_call_operand.hbm [shape: bf16[4,128,512], index: 3, kind: input, shape index: {}]   ;;  %s3562_s4 = inlined_call_operand.vmem [shape: f32[4,1,512], index: 4, kind: input, shape index: {}]   ;;  %s3563_s5 = inlined_call_operand.vmem [shape: bf16[9,32,128], index: 5, kind: input, shape index: {}]   ;;  %s3564_s6 = inlined_call_operand.vmem [shape: f32[1,128], index: 6, kind: input, shape index: {}]   ;;  %s3565_s7 = inlined_call_operand.vmem [shape: f32[8,128], index: 7, kind: output, shape index: {0}]   ;;  %s3566_s8 = inlined_call_operand.hbm [shape: f32[1,1], index: 8, kind: output, shape index: {1}]  }
   0x1   :  { %15 = vsyncpa [#allocation4], 0  ;;  %s26_s29 = sshll.u32 %s3561_s3, 4  ;;  %s3137_s30 = smov [#allocation2]   ;;  %s27_s29 = int_to_ptr.hbm [resolvable:$true] %s26_s29 }
   0x2   :  { %s28_s9 = sshll.u32 %s3137_s30, 4  ;;  %s3138_s10 = smov 256   ;;  %s29_s9 = int_to_ptr.vmem [resolvable:$true] %s28_s9 }
   0x3   :  { %s3139_s11 = smov 16  }
   0x4   :  { %34 = dma.hbm_to_vmem [thread:$0]  %s27_s29, 16384, %s29_s9, [#allocation3], %s3138_s10, %s3138_s10, %s3139_s11  }
   0x5   :  { %3133 = dma.done.wait [#allocation3], 16384  }
   0x6   :  { %3134 = vsyncadd [#allocation3], 4294950912  ;;  %v2306_v0 = vld [vmem:[#allocation2 + $0xe0] sm:$0xf]  ;;  %v2874_v1 = vld [vmem:[#allocation2 + $0xec] sm:$0xf0] }
   0x7   :  { %v2873_v2 = vld [vmem:[#allocation2 + $0xec] sm:$0xf]  ;;  %v2307_v3 = vor.u32 %v2874_v1, %v2306_v0  ;;  %v2316_v4 = vld [vmem:[#allocation2 + $0xf8] sm:$0xf0]  ;;  %v2290_v5 = vld [vmem:[#allocation2 + $0xc0] sm:$0xf] }
   0x8   :  { %v2870_v6 = vld [vmem:[#allocation2 + $0xcc] sm:$0xf0]  ;;  %v2319_v7 = vor.u32 %v2873_v2, %v2316_v4  ;;  %v2869_v8 = vld [vmem:[#allocation2 + $0xcc] sm:$0xf]  ;;  %v2300_v9 = vld [vmem:[#allocation2 + $0xd8] sm:$0xf0] }
   0x9   :  { %249 = vmatpush.bf16.msra.mxu0 %v2307_v3  ;;  %v2291_v10 = vor.u32 %v2870_v6, %v2290_v5  ;;  %v2274_v11 = vld [vmem:[#allocation2 + $0xa0] sm:$0xf]  ;;  %v2872_v12 = vld [vmem:[#allocation2 + $0xe4] sm:$0xf]  ;;  %v2308_v13 = vld [vmem:[#allocation2 + $0xf0] sm:$0xf0]  ;;  %v2303_v14 = vor.u32 %v2869_v8, %v2300_v9 }
   0xa   :  { %288 = vmatpush.bf16.msra.mxu3 %v2319_v7  ;;  %v2866_v15 = vld [vmem:[#allocation2 + $0xac] sm:$0xf0]  ;;  %v2311_v16 = vor.u32 %v2872_v12, %v2308_v13  ;;  %v2314_v17 = vld [vmem:[#allocation2 + $0xe8] sm:$0xf]  ;;  %v2875_v18 = vld [vmem:[#allocation2 + $0xf4] sm:$0xf0] }
   0xb   :  { %v2315_v19 = vor.u32 %v2875_v18, %v2314_v17  ;;  %v2865_v20 = vld [vmem:[#allocation2 + $0xac] sm:$0xf]  ;;  %v2284_v21 = vld [vmem:[#allocation2 + $0xb8] sm:$0xf0]  ;;  %v2868_v22 = vld [vmem:[#allocation2 + $0xc4] sm:$0xf]  ;;  %v2275_v25 = vor.u32 %v2866_v15, %v2274_v11 }
   0xc   :  { %262 = vmatpush.bf16.msra.mxu1 %v2311_v16  ;;  %v2292_v23 = vld [vmem:[#allocation2 + $0xd0] sm:$0xf0]  ;;  %v2298_v24 = vld [vmem:[#allocation2 + $0xc8] sm:$0xf]  ;;  %v2258_v26 = vld [vmem:[#allocation2 + $0x80] sm:$0xf]  ;;  %v2287_v30 = vor.u32 %v2865_v20, %v2284_v21 }
   0xd   :  { %250 = vmatpush.bf16.msra.mxu0 %v2291_v10  ;;  %275 = vmatpush.bf16.msra.mxu2 %v2315_v19  ;;  %v2862_v27 = vld [vmem:[#allocation2 + $0x8c] sm:$0xf0]  ;;  %v2295_v28 = vor.u32 %v2868_v22, %v2292_v23  ;;  %v2871_v29 = vld [vmem:[#allocation2 + $0xd4] sm:$0xf0]  ;;  %v2861_v32 = vld [vmem:[#allocation2 + $0x8c] sm:$0xf] }
   0xe   :  { %289 = vmatpush.bf16.msra.mxu3 %v2303_v14  ;;  %v2299_v31 = vor.u32 %v2871_v29, %v2298_v24  ;;  %v2268_v33 = vld [vmem:[#allocation2 + $0x98] sm:$0xf0]  ;;  %v2864_v34 = vld [vmem:[#allocation2 + $0xa4] sm:$0xf]  ;;  %v2276_v35 = vld [vmem:[#allocation2 + $0xb0] sm:$0xf0]  ;;  %v2259_v39 = vor.u32 %v2862_v27, %v2258_v26 }
   0xf   :  { %v2282_v36 = vld [vmem:[#allocation2 + $0xa8] sm:$0xf]  ;;  %v2867_v37 = vld [vmem:[#allocation2 + $0xb4] sm:$0xf0]  ;;  %v2279_v38 = vor.u32 %v2864_v34, %v2276_v35  ;;  %v2242_v40 = vld [vmem:[#allocation2 + $0x60] sm:$0xf]  ;;  %v2271_v44 = vor.u32 %v2861_v32, %v2268_v33 }
  0x10   :  { %263 = vmatpush.bf16.msra.mxu1 %v2295_v28  ;;  %v2283_v41 = vor.u32 %v2867_v37, %v2282_v36  ;;  %v2860_v42 = vld [vmem:[#allocation2 + $0x84] sm:$0xf]  ;;  %v2260_v43 = vld [vmem:[#allocation2 + $0x90] sm:$0xf0]  ;;  %v2858_v45 = vld [vmem:[#allocation2 + $0x6c] sm:$0xf0] }
  0x11   :  { %251 = vmatpush.bf16.msra.mxu0 %v2275_v25  ;;  %276 = vmatpush.bf16.msra.mxu2 %v2299_v31  ;;  %v2266_v46 = vld [vmem:[#allocation2 + $0x88] sm:$0xf]  ;;  %v2863_v47 = vld [vmem:[#allocation2 + $0x94] sm:$0xf0]  ;;  %v2857_v48 = vld [vmem:[#allocation2 + $0x6c] sm:$0xf]  ;;  %v2263_v50 = vor.u32 %v2860_v42, %v2260_v43  ;;  %v2243_v51 = vor.u32 %v2858_v45, %v2242_v40 }
  0x12   :  { %290 = vmatpush.bf16.msra.mxu3 %v2287_v30  ;;  %v2252_v49 = vld [vmem:[#allocation2 + $0x78] sm:$0xf0]  ;;  %v2226_v52 = vld [vmem:[#allocation2 + $0x40] sm:$0xf]  ;;  %v2267_v53 = vor.u32 %v2863_v47, %v2266_v46  ;;  %v2856_v54 = vld [vmem:[#allocation2 + $0x64] sm:$0xf] }
  0x13   :  { %v2244_v55 = vld [vmem:[#allocation2 + $0x70] sm:$0xf0]  ;;  %v2255_v56 = vor.u32 %v2857_v48, %v2252_v49  ;;  %v2854_v57 = vld [vmem:[#allocation2 + $0x4c] sm:$0xf0]  ;;  %v2250_v58 = vld [vmem:[#allocation2 + $0x68] sm:$0xf] }
  0x14   :  { %264 = vmatpush.bf16.msra.mxu1 %v2279_v38  ;;  %v2859_v59 = vld [vmem:[#allocation2 + $0x74] sm:$0xf0]  ;;  %v2853_v60 = vld [vmem:[#allocation2 + $0x4c] sm:$0xf]  ;;  %v2236_v61 = vld [vmem:[#allocation2 + $0x58] sm:$0xf0]  ;;  %v2247_v62 = vor.u32 %v2856_v54, %v2244_v55  ;;  %v2227_v63 = vor.u32 %v2854_v57, %v2226_v52 }
  0x15   :  { %252 = vmatpush.bf16.msra.mxu0 %v2259_v39  ;;  %277 = vmatpush.bf16.msra.mxu2 %v2283_v41  ;;  %v2210_v0 = vld [vmem:[#allocation2 + $0x20] sm:$0xf]  ;;  %v2251_v1 = vor.u32 %v2859_v59, %v2250_v58  ;;  %v2852_v2 = vld [vmem:[#allocation2 + $0x44] sm:$0xf]  ;;  %v2228_v3 = vld [vmem:[#allocation2 + $0x50] sm:$0xf0]  ;;  %v2239_v4 = vor.u32 %v2853_v60, %v2236_v61 }
  0x16   :  { %291 = vmatpush.bf16.msra.mxu3 %v2271_v44  ;;  %v2850_v5 = vld [vmem:[#allocation2 + $0x2c] sm:$0xf0]  ;;  %v2234_v6 = vld [vmem:[#allocation2 + $0x48] sm:$0xf]  ;;  %v2855_v7 = vld [vmem:[#allocation2 + $0x54] sm:$0xf0]  ;;  %v2231_v10 = vor.u32 %v2852_v2, %v2228_v3 }
  0x17   :  { %v2849_v8 = vld [vmem:[#allocation2 + $0x2c] sm:$0xf]  ;;  %v2220_v9 = vld [vmem:[#allocation2 + $0x38] sm:$0xf0]  ;;  %v2211_v11 = vor.u32 %v2850_v5, %v2210_v0  ;;  %v2194_v12 = vld [vmem:[#allocation2] sm:$0xf]  ;;  %v2235_v13 = vor.u32 %v2855_v7, %v2234_v6 }
  0x18   :  { %265 = vmatpush.bf16.msra.mxu1 %v2263_v50  ;;  %v2848_v14 = vld [vmem:[#allocation2 + $0x24] sm:$0xf]  ;;  %v2212_v15 = vld [vmem:[#allocation2 + $0x30] sm:$0xf0]  ;;  %v2223_v16 = vor.u32 %v2849_v8, %v2220_v9  ;;  %v2846_v17 = vld [vmem:[#allocation2 + $0xc] sm:$0xf0] }
  0x19   :  { %253 = vmatpush.bf16.msra.mxu0 %v2243_v51  ;;  %278 = vmatpush.bf16.msra.mxu2 %v2267_v53  ;;  %v2218_v18 = vld [vmem:[#allocation2 + $0x28] sm:$0xf]  ;;  %v2851_v19 = vld [vmem:[#allocation2 + $0x34] sm:$0xf0]  ;;  %v2845_v20 = vld [vmem:[#allocation2 + $0xc] sm:$0xf]  ;;  %v2215_v22 = vor.u32 %v2848_v14, %v2212_v15  ;;  %v2195_v23 = vor.u32 %v2846_v17, %v2194_v12 }
  0x1a   :  { %292 = vmatpush.bf16.msra.mxu3 %v2255_v56  ;;  %v2204_v21 = vld [vmem:[#allocation2 + $0x18] sm:$0xf0]  ;;  %v2219_v24 = vor.u32 %v2851_v19, %v2218_v18  ;;  %v2844_v25 = vld [vmem:[#allocation2 + $0x4] sm:$0xf]  ;;  %v2196_v26 = vld [vmem:[#allocation2 + $0x10] sm:$0xf0] }
  0x1b   :  { %v2207_v27 = vor.u32 %v2845_v20, %v2204_v21  ;;  %v2202_v28 = vld [vmem:[#allocation2 + $0x8] sm:$0xf]  ;;  %v2847_v29 = vld [vmem:[#allocation2 + $0x14] sm:$0xf0]  ;;  %v2199_v30 = vor.u32 %v2844_v25, %v2196_v26  ;;  %v46_v31 = vld [vmem:[%s3559_s1] sm:$0xf] }
  0x1c   :  { %266 = vmatpush.bf16.msra.mxu1 %v2247_v62  ;;  %v2203_v32 = vor.u32 %v2847_v29, %v2202_v28  ;;  %v79_v33 = vld [vmem:[%s3562_s4] sm:$0xf]  ;;  %s3140_s15 = smov 32   ;;  %s3141_s1 = smov 64  }
  0x1d   :  { %254 = vmatpush.bf16.msra.mxu0 %v2227_v63  ;;  %279 = vmatpush.bf16.msra.mxu2 %v2251_v1  ;;  %v81_v34 = vperm.slane %v79_v33, 0  ;;  %v82_v37 = vperm.slane %v79_v33, 1  ;;  %v84_v39 = vperm.slane %v79_v33, 3  ;;  %v83_v44 = vperm.slane %v79_v33, 2  ;;  %s3142_s16 = smov 96   ;;  %s3144_s26 = smov [#allocation5]  }
  0x1e   :  { %293 = vmatpush.bf16.msra.mxu3 %v2239_v4 }
  0x20   :  { %267 = vmatpush.bf16.msra.mxu1 %v2231_v10 }
  0x21   :  { %255 = vmatpush.bf16.msra.mxu0 %v2211_v11  ;;  %280 = vmatpush.bf16.msra.mxu2 %v2235_v13 }
  0x22   :  { %294 = vmatpush.bf16.msra.mxu3 %v2223_v16 }
  0x24   :  { %268 = vmatpush.bf16.msra.mxu1 %v2215_v22 }
  0x25   :  { %256 = vmatpush.bf16.msra.mxu0 %v2195_v23  ;;  %281 = vmatpush.bf16.msra.mxu2 %v2219_v24 }
  0x26   :  { %295 = vmatpush.bf16.msra.mxu3 %v2207_v27  ;;  %v2433_v27 = vld [vmem:[#allocation2 + $0x2d8] sm:$0xf0] }
  0x28   :  { %257 = vmatmul.bf16.vlgmr.msra.gmra.mxu0 %v46_v31  ;;  %269 = vmatpush.bf16.msra.mxu1 %v2199_v30 }
  0x29   :  { %296 = vmatmul.bf16.vlgmr.msra.gmra.mxu3 %v46_v31  ;;  %282 = vmatpush.bf16.msra.mxu2 %v2203_v32 }
  0x2b   :  { %270 = vmatmul.bf16.vlgmr.msra.gmra.mxu1 %v46_v31 }
  0x2c   :  { %283 = vmatmul.bf16.vlgmr.msra.gmra.mxu2 %v46_v31 }
  0xa5   :  { %v258_v35 = vpop.f32.mrf.mxu0 }
  0xa6   :  { %v3199_v36 = vadd.f32 %v258_v35, %v81_v34 }
  0xa8   :  { %321 = vrot.lane.b32.xlu0 %v3199_v36, %s3140_s15  ;;  %v271_v38 = vpop.f32.mrf.mxu1  ;;  %v2320_v50 = vmul.f32 -1.442695, %v3199_v36 }
  0xa9   :  { %v3203_v41 = vadd.f32 %v271_v38, %v82_v37 }
  0xaa   :  { %3001 = vpow2.f32 %v2320_v50 }
  0xab   :  { %v2321_v52 = vmul.f32 -1.442695, %v3203_v41 }
  0xac   :  { %v297_v40 = vpop.f32.mrf.mxu3 }
  0xad   :  { %v3205_v42 = vadd.f32 %v297_v40, %v84_v39  ;;  %v260_v43 = vpop.f32.mrf.mxu0 }
  0xaf   :  { %441 = vrot.lane.b32.xlu1 %v3205_v42, %s3140_s15  ;;  %v284_v45 = vpop.f32.mrf.mxu2  ;;  %v2323_v51 = vmul.f32 -1.442695, %v3205_v42 }
  0xb0   :  { %361 = vrot.lane.b32.xlu0 %v3203_v41, %s3140_s15  ;;  %v273_v46 = vpop.f32.mrf.mxu1  ;;  %v3211_v47 = vadd.f32 %v284_v45, %v83_v44  ;;  %v3002_v53 = vpop.eup %3001 }
  0xb1   :  { %3003 = vpow2.f32 %v2323_v51  ;;  %v304_v54 = vadd.f32 1.0, %v3002_v53 }
  0xb2   :  { %3005 = vpow2.f32 %v2321_v52  ;;  %v2322_v55 = vmul.f32 -1.442695, %v3211_v47 }
  0xb3   :  { %3007 = vrcp.f32 %v304_v54  ;;  %vm310_vm0 = vweird.f32 %v304_v54  ;;  %v316_v7 = vand.u32 2147483648, %v304_v54  ;;  %v314_v10 = vand.u32 2147483647, %v304_v54 }
  0xb4   :  { %v299_v48 = vpop.f32.mrf.mxu3  ;;  %3009 = vpow2.f32 %v2322_v55 }
  0xb5   :  { %v317_v13 = vor.u32 1.1754944e-38, %v316_v7  ;;  %vm315_vm3 = vcmp.eq.f32.partialorder %v314_v10, 8.507059e+37  ;;  %v2904_v7 = vld [vmem:[#allocation2 + $0x2e4] sm:$0xf]  ;;  %v2447_v10 = vld [vmem:[#allocation2 + $0x2e8] sm:$0xf] }
  0xb7   :  { %401 = vrot.lane.b32.xlu1 %v3211_v47, %s3140_s15  ;;  %v286_v49 = vpop.f32.mrf.mxu2  ;;  %v3004_v56 = vpop.eup %3003 }
  0xb8   :  { %v3006_v57 = vpop.eup %3005  ;;  %v424_v58 = vadd.f32 1.0, %v3004_v56 }
  0xb9   :  { %v344_v59 = vadd.f32 1.0, %v3006_v57  ;;  %v3008_v60 = vpop.eup %3007 }
  0xba   :  { %v3010_v61 = vpop.eup %3009  ;;  %3011 = vrcp.f32 %v424_v58  ;;  %v306_v63 = vmul.f32 %v3008_v60, %v304_v54  ;;  %vm311_vm1 = vweird.f32 %v3008_v60  ;;  %v436_v23 = vand.u32 2147483648, %v424_v58 }
  0xbb   :  { %3013 = vrcp.f32 %v344_v59  ;;  %v3219_v62 = vadd.f32 1.0, %v3010_v61  ;;  %vm312_vm2 = vmor %vm310_vm0, %vm311_vm1  ;;  %vm350_vm4 = vweird.f32 %v344_v59  ;;  %v356_v21 = vand.u32 2147483648, %v344_v59 }
  0xbc   :  { %v307_v1 = vsub.f32 1.0, %v306_v63  ;;  %v354_v25 = vand.u32 2147483647, %v344_v59  ;;  %vm430_vm7 = vweird.f32 %v424_v58  ;;  %v434_v26 = vand.u32 2147483647, %v424_v58 }
  0xbd   :  { %3015 = vrcp.f32 %v3219_v62  ;;  %v357_v30 = vor.u32 1.1754944e-38, %v356_v21  ;;  %vm390_vm10 = vweird.f32 %v3219_v62  ;;  %v437_v31 = vor.u32 1.1754944e-38, %v436_v23  ;;  %v2431_v23 = vld [vmem:[#allocation2 + $0x2c8] sm:$0xf] }
  0xbe   :  { %v308_v4 = vmul.f32 %v3008_v60, %v307_v1  ;;  %vm355_vm12 = vcmp.eq.f32.partialorder %v354_v25, 8.507059e+37  ;;  %v396_v33 = vand.u32 2147483648, %v3219_v62  ;;  %vm435_vm13 = vcmp.eq.f32.partialorder %v434_v26, 8.507059e+37  ;;  %v2901_v25 = vld [vmem:[#allocation2 + $0x2cc] sm:$0xf] }
  0xbf   :  { %v394_v35 = vand.u32 2147483647, %v3219_v62  ;;  %vm473_vm0 = vcmask 261120   ;;  %vm475_vm1 = vcmask 523264  }
  0xc0   :  { %v3012_v0 = vpop.eup %3011  ;;  %v309_v9 = vadd.f32 %v3008_v60, %v308_v4  ;;  %v397_v45 = vor.u32 1.1754944e-38, %v396_v33  ;;  %v2415_v33 = vld [vmem:[#allocation2 + $0x2a8] sm:$0xf] }
  0xc1   :  { %v3014_v2 = vpop.eup %3013  ;;  %v426_v3 = vmul.f32 %v3012_v0, %v424_v58  ;;  %vm431_vm6 = vweird.f32 %v3012_v0  ;;  %vm395_vm15 = vcmp.eq.f32.partialorder %v394_v35, 8.507059e+37  ;;  %v2899_v35 = vld [vmem:[#allocation2 + $0x2b4] sm:$0xf0] }
  0xc2   :  { %v346_v5 = vmul.f32 %v3014_v2, %v344_v59  ;;  %v313_v15 = vsel %vm312_vm2, %v3008_v60, %v309_v9  ;;  %vm351_vm5 = vweird.f32 %v3014_v2  ;;  %vm432_vm9 = vmor %vm430_vm7, %vm431_vm6  ;;  %v2441_v9 = vld [vmem:[#allocation2 + $0x2f0] sm:$0xf0]  ;;  %vm477_vm2 = vcmask 785408  }
  0xc3   :  { %v3016_v6 = vpop.eup %3015  ;;  %v427_v8 = vsub.f32 1.0, %v426_v3  ;;  %v3223_v19 = vsel %vm315_vm3, %v317_v13, %v313_v15  ;;  %vm3226_vm8 = vmor %vm350_vm4, %vm351_vm5  ;;  %v2449_v15 = vld [vmem:[#allocation2 + $0x2f8] sm:$0xf0] }
  0xc4   :  { %v347_v11 = vsub.f32 1.0, %v346_v5  ;;  %v386_v12 = vmul.f32 %v3016_v6, %v3219_v62  ;;  %vm391_vm11 = vweird.f32 %v3016_v6  ;;  %v2439_v5 = vld [vmem:[#allocation2 + $0x2e0] sm:$0xf] }
  0xc5   :  { %v428_v14 = vmul.f32 %v3012_v0, %v427_v8  ;;  %vm392_vm14 = vmor %vm390_vm10, %vm391_vm11 }
  0xc6   :  { %v348_v16 = vmul.f32 %v3014_v2, %v347_v11  ;;  %v387_v17 = vsub.f32 1.0, %v386_v12  ;;  %v2907_v11 = vld [vmem:[#allocation2 + $0x2f4] sm:$0xf0]  ;;  %v2444_v12 = vor.u32 %v2904_v7, %v2441_v9  ;;  %v2359_v7 = vld [vmem:[#allocation2 + $0x240] sm:$0xf] }
  0xc7   :  { %v429_v20 = vadd.f32 %v3012_v0, %v428_v14  ;;  %v2448_v13 = vor.u32 %v2907_v11, %v2447_v10  ;;  %v2905_v14 = vld [vmem:[#allocation2 + $0x2ec] sm:$0xf]  ;;  %v2884_v9 = vld [vmem:[#allocation2 + $0x244] sm:$0xf]  ;;  %v2361_v11 = vld [vmem:[#allocation2 + $0x250] sm:$0xf0] }
  0xc8   :  { %v349_v24 = vadd.f32 %v3014_v2, %v348_v16  ;;  %v388_v28 = vmul.f32 %v3016_v6, %v387_v17  ;;  %v2423_v16 = vld [vmem:[#allocation2 + $0x2c0] sm:$0xf]  ;;  %v2452_v17 = vor.u32 %v2905_v14, %v2449_v15  ;;  %697 = vmatpush.bf16.msrb.mxu1 %v2444_v12  ;;  %v2367_v12 = vld [vmem:[#allocation2 + $0x248] sm:$0xf]  ;;  %v2364_v14 = vor.u32 %v2884_v9, %v2361_v11 }
  0xc9   :  { %v433_v29 = vsel %vm432_vm9, %v3012_v0, %v429_v20  ;;  %v2425_v20 = vld [vmem:[#allocation2 + $0x2d0] sm:$0xf0]  ;;  %710 = vmatpush.bf16.msrb.mxu2 %v2448_v13  ;;  %v2887_v13 = vld [vmem:[#allocation2 + $0x254] sm:$0xf0]  ;;  %v2544_v11 = vld [vmem:[#allocation2 + $0x1a8] sm:$0xf] }
  0xca   :  { %v353_v32 = vsel %vm3226_vm8, %v3014_v2, %v349_v24  ;;  %v389_v34 = vadd.f32 %v3016_v6, %v388_v28  ;;  %v438_v38 = vsel %vm435_vm13, %v437_v31, %v433_v29  ;;  %v2903_v24 = vld [vmem:[#allocation2 + $0x2d4] sm:$0xf0]  ;;  %723 = vmatpush.bf16.msrb.mxu3 %v2452_v17  ;;  %v2407_v28 = vld [vmem:[#allocation2 + $0x2a0] sm:$0xf]  ;;  %v2898_v29 = vld [vmem:[#allocation2 + $0x2ac] sm:$0xf0]  ;;  %v2368_v15 = vor.u32 %v2887_v13, %v2367_v12 }
  0xcb   :  { %v358_v40 = vsel %vm355_vm12, %v357_v30, %v353_v32  ;;  %v2432_v26 = vor.u32 %v2903_v24, %v2431_v23  ;;  %v2436_v30 = vor.u32 %v2901_v25, %v2433_v27  ;;  %v2896_v31 = vld [vmem:[#allocation2 + $0x2a4] sm:$0xf]  ;;  %v2409_v32 = vld [vmem:[#allocation2 + $0x2b0] sm:$0xf0]  ;;  %v2369_v17 = vld [vmem:[#allocation2 + $0x258] sm:$0xf0] }
  0xcc   :  { %v393_v46 = vsel %vm392_vm14, %v3016_v6, %v389_v34  ;;  %v2906_v6 = vld [vmem:[#allocation2 + $0x2ec] sm:$0xf0]  ;;  %v2408_v34 = vor.u32 %v2898_v29, %v2407_v28  ;;  %v2351_v25 = vld [vmem:[#allocation2 + $0x228] sm:$0xf]  ;;  %v2881_v27 = vld [vmem:[#allocation2 + $0x22c] sm:$0xf] }
  0xcd   :  { %v398_v48 = vsel %vm395_vm15, %v397_v45, %v393_v46  ;;  %v2440_v8 = vor.u32 %v2906_v6, %v2439_v5  ;;  %711 = vmatpush.bf16.msrb.mxu2 %v2432_v26  ;;  %v2385_v5 = vld [vmem:[#allocation2 + $0x278] sm:$0xf0]  ;;  %v2883_v26 = vld [vmem:[#allocation2 + $0x234] sm:$0xf0]  ;;  %v2929_v13 = vld [vmem:[#allocation2 + $0x1ac] sm:$0xf] }
  0xce   :  { %724 = vmatpush.bf16.msrb.mxu3 %v2436_v30  ;;  %v2352_v28 = vor.u32 %v2883_v26, %v2351_v25  ;;  %v2353_v29 = vld [vmem:[#allocation2 + $0x238] sm:$0xf0]  ;;  %v2327_v30 = vld [vmem:[#allocation2 + $0x200] sm:$0xf]  ;;  %v2931_v12 = vld [vmem:[#allocation2 + $0x1b4] sm:$0xf0] }
  0xcf   :  { %684 = vmatpush.bf16.msrb.mxu0 %v2440_v8  ;;  %v2886_v8 = vld [vmem:[#allocation2 + $0x24c] sm:$0xf0]  ;;  %v2927_v25 = vld [vmem:[#allocation2 + $0x194] sm:$0xf0] }
  0xd0   :  { %v2360_v10 = vor.u32 %v2886_v8, %v2359_v7  ;;  %v2930_v7 = vld [vmem:[#allocation2 + $0x1ac] sm:$0xf0]  ;;  %v2928_v8 = vld [vmem:[#allocation2 + $0x1a4] sm:$0xf] }
 0x11a   :  { %v322_v18 = vpop.permute.xlu0 %321 }
 0x11b   :  { %v324_v22 = vmul.f32 %v322_v18, %v3223_v19  ;;  %v2902_v18 = vld [vmem:[#allocation2 + $0x2cc] sm:$0xf0] }
 0x11c   :  { %v2424_v21 = vor.u32 %v2902_v18, %v2423_v16  ;;  %v2885_v16 = vld [vmem:[#allocation2 + $0x24c] sm:$0xf]  ;;  %v2343_v18 = vld [vmem:[#allocation2 + $0x220] sm:$0xf] }
 0x11d   :  { %326 = vrot.lane.b32.xlu2 %v324_v22, %s3141_s1 }
 0x11e   :  { %685 = vmatpush.bf16.msrb.mxu0 %v2424_v21  ;;  %v2880_v21 = vld [vmem:[#allocation2 + $0x224] sm:$0xf] }
 0x121   :  { %v442_v37 = vpop.permute.xlu1 %441 }
 0x122   :  { %v444_v39 = vmul.f32 %v442_v37, %v438_v38  ;;  %v362_v43 = vpop.permute.xlu0 %361  ;;  %v2897_v37 = vld [vmem:[#allocation2 + $0x2ac] sm:$0xf]  ;;  %686 = vmatpush.bf16.msrb.mxu0 %v2408_v34  ;;  %v2329_v34 = vld [vmem:[#allocation2 + $0x210] sm:$0xf0] }
 0x123   :  { %v364_v44 = vmul.f32 %v362_v43, %v358_v40 }
 0x124   :  { %446 = vrot.lane.b32.xlu0 %v444_v39, %s3141_s1  ;;  %v2412_v39 = vor.u32 %v2896_v31, %v2409_v32  ;;  %v2878_v31 = vld [vmem:[#allocation2 + $0x20c] sm:$0xf0]  ;;  %v2356_v32 = vor.u32 %v2881_v27, %v2353_v29  ;;  %v2530_v29 = vld [vmem:[#allocation2 + $0x198] sm:$0xf0] }
 0x125   :  { %366 = vrot.lane.b32.xlu2 %v364_v44, %s3141_s1 }
 0x129   :  { %v402_v49 = vpop.permute.xlu1 %401 }
 0x12a   :  { %v404_v50 = vmul.f32 %v402_v49, %v398_v48  ;;  %v2391_v49 = vld [vmem:[#allocation2 + $0x280] sm:$0xf] }
 0x12c   :  { %406 = vrot.lane.b32.xlu1 %v404_v50, %s3141_s1  ;;  %v2894_v50 = vld [vmem:[#allocation2 + $0x28c] sm:$0xf0] }
 0x177   :  { %v327_v51 = vpop.permute.xlu2 %326 }
 0x178   :  { %v329_v52 = vadd.f32 %v327_v51, %v3199_v36  ;;  %v2892_v51 = vld [vmem:[#allocation2 + $0x284] sm:$0xf] }
 0x17a   :  { %3017 = vtanh.f32 %v329_v52  ;;  %v2392_v52 = vor.u32 %v2894_v50, %v2391_v49  ;;  %v2938_v49 = vld [vmem:[#allocation2 + $0x1ec] sm:$0xf0]  ;;  %v2936_v50 = vld [vmem:[#allocation2 + $0x1e4] sm:$0xf] }
 0x17c   :  { %687 = vmatpush.bf16.msrb.mxu0 %v2392_v52 }
 0x17f   :  { %v367_v53 = vpop.permute.xlu2 %366 }
 0x180   :  { %v3018_v54 = vpop.eup %3017  ;;  %v369_v55 = vadd.f32 %v367_v53, %v3203_v41  ;;  %v2393_v53 = vld [vmem:[#allocation2 + $0x290] sm:$0xf0] }
 0x181   :  { %332 = vrot.lane.b32.xlu2 %v3018_v54, %s3142_s16 }
 0x182   :  { %3019 = vtanh.f32 %v369_v55  ;;  %v2895_v55 = vld [vmem:[#allocation2 + $0x294] sm:$0xf0] }
 0x188   :  { %v3242_v56 = vpop.eup %3019 }
 0x189   :  { %372 = vrot.lane.b32.xlu0 %v3242_v56, %s3142_s16 }
 0x196   :  { %v447_v57 = vpop.permute.xlu0 %446 }
 0x197   :  { %v449_v58 = vadd.f32 %v447_v57, %v3205_v42  ;;  %v2396_v57 = vor.u32 %v2892_v51, %v2393_v53  ;;  %v2570_v53 = vld [vmem:[#allocation2 + $0x1f0] sm:$0xf0] }
 0x199   :  { %3021 = vtanh.f32 %v449_v58 }
 0x19e   :  { %v407_v59 = vpop.permute.xlu1 %406 }
 0x19f   :  { %v3247_v36 = vpop.eup %3021  ;;  %v409_v60 = vadd.f32 %v407_v59, %v3211_v47  ;;  %v2893_v59 = vld [vmem:[#allocation2 + $0x28c] sm:$0xf] }
 0x1a0   :  { %452 = vrot.lane.b32.xlu1 %v3247_v36, %s3142_s16 }
 0x1a1   :  { %3023 = vtanh.f32 %v409_v60  ;;  %v2375_v60 = vld [vmem:[#allocation2 + $0x260] sm:$0xf] }
 0x1a7   :  { %v3252_v41 = vpop.eup %3023 }
 0x1a8   :  { %412 = vrot.lane.b32.xlu2 %v3252_v41, %s3142_s16 }
 0x1db   :  { %v333_v61 = vpop.permute.xlu2 %332 }
 0x1dc   :  { %v335_v62 = vmul.f32 %v333_v61, %v3223_v19  ;;  %v2900_v19 = vld [vmem:[#allocation2 + $0x2c4] sm:$0xf]  ;;  %v2890_v61 = vld [vmem:[#allocation2 + $0x26c] sm:$0xf0] }
 0x1dd   :  { %v2428_v22 = vor.u32 %v2900_v19, %v2425_v20  ;;  %v2372_v19 = vor.u32 %v2885_v16, %v2369_v17  ;;  %v2882_v20 = vld [vmem:[#allocation2 + $0x22c] sm:$0xf0]  ;;  %v2545_v17 = vor.u32 %v2931_v12, %v2544_v11  ;;  %v2464_v11 = vld [vmem:[#allocation2 + $0x108] sm:$0xf]  ;;  %v2911_v12 = vld [vmem:[#allocation2 + $0x114] sm:$0xf0] }
 0x1de   :  { %337 = vrot.lane.b32.xlu0 %v335_v62, %s3140_s15  ;;  %v2888_v62 = vld [vmem:[#allocation2 + $0x264] sm:$0xf]  ;;  %v2344_v23 = vor.u32 %v2882_v20, %v2343_v18  ;;  %v2926_v20 = vld [vmem:[#allocation2 + $0x18c] sm:$0xf0] }
 0x1df   :  { %698 = vmatpush.bf16.msrb.mxu1 %v2428_v22  ;;  %v2345_v22 = vld [vmem:[#allocation2 + $0x230] sm:$0xf0] }
 0x1e0   :  { %v2348_v24 = vor.u32 %v2880_v21, %v2345_v22  ;;  %v2924_v21 = vld [vmem:[#allocation2 + $0x184] sm:$0xf] }
 0x1e3   :  { %699 = vmatpush.bf16.msrb.mxu1 %v2412_v39  ;;  %v2877_v39 = vld [vmem:[#allocation2 + $0x20c] sm:$0xf] }
 0x1e7   :  { %700 = vmatpush.bf16.msrb.mxu1 %v2396_v57  ;;  %v2573_v57 = vor.u32 %v2936_v50, %v2570_v53  ;;  %v2918_v50 = vld [vmem:[#allocation2 + $0x14c] sm:$0xf0] }
 0x1fb   :  { %v373_v42 = vpop.permute.xlu0 %372 }
 0x1fc   :  { %v375_v63 = vmul.f32 %v373_v42, %v358_v40  ;;  %v2416_v40 = vor.u32 %v2899_v35, %v2415_v33  ;;  %v2377_v42 = vld [vmem:[#allocation2 + $0x270] sm:$0xf0]  ;;  %v2876_v33 = vld [vmem:[#allocation2 + $0x204] sm:$0xf]  ;;  %v2335_v35 = vld [vmem:[#allocation2 + $0x208] sm:$0xf] }
 0x1fe   :  { %377 = vrot.lane.b32.xlu1 %v375_v63, %s3140_s15  ;;  %712 = vmatpush.bf16.msrb.mxu2 %v2416_v40  ;;  %v2376_v63 = vor.u32 %v2890_v61, %v2375_v60  ;;  %v2337_v40 = vld [vmem:[#allocation2 + $0x218] sm:$0xf0]  ;;  %v2552_v60 = vld [vmem:[#allocation2 + $0x1c0] sm:$0xf]  ;;  %v2934_v61 = vld [vmem:[#allocation2 + $0x1cc] sm:$0xf0] }
 0x1ff   :  { %v2340_v51 = vor.u32 %v2877_v39, %v2337_v40 }
 0x200   :  { %688 = vmatpush.bf16.msrb.mxu0 %v2376_v63  ;;  %v2560_v63 = vld [vmem:[#allocation2 + $0x1c8] sm:$0xf] }
 0x202   :  { %v413_v0 = vpop.permute.xlu2 %412 }
 0x203   :  { %v415_v47 = vmul.f32 %v413_v0, %v398_v48  ;;  %v2380_v0 = vor.u32 %v2888_v62, %v2377_v42  ;;  %v2932_v62 = vld [vmem:[#allocation2 + $0x1c4] sm:$0xf]  ;;  %v2554_v42 = vld [vmem:[#allocation2 + $0x1d0] sm:$0xf0] }
 0x204   :  { %689 = vmatpush.bf16.msrb.mxu0 %v2360_v10  ;;  %v2538_v10 = vld [vmem:[#allocation2 + $0x1b0] sm:$0xf0] }
 0x205   :  { %417 = vrot.lane.b32.xlu0 %v415_v47, %s3140_s15  ;;  %v2383_v47 = vld [vmem:[#allocation2 + $0x268] sm:$0xf]  ;;  %701 = vmatpush.bf16.msrb.mxu1 %v2380_v0  ;;  %v2935_v0 = vld [vmem:[#allocation2 + $0x1d4] sm:$0xf0]  ;;  %v2541_v16 = vor.u32 %v2928_v8, %v2538_v10  ;;  %v2908_v8 = vld [vmem:[#allocation2 + $0x104] sm:$0xf] }
 0x206   :  { %v2458_v10 = vld [vmem:[#allocation2 + $0x110] sm:$0xf0] }
 0x208   :  { %690 = vmatpush.bf16.msrb.mxu0 %v2344_v23  ;;  %v2522_v23 = vld [vmem:[#allocation2 + $0x190] sm:$0xf0] }
 0x209   :  { %702 = vmatpush.bf16.msrb.mxu1 %v2364_v14  ;;  %v2546_v14 = vld [vmem:[#allocation2 + $0x1b8] sm:$0xf0]  ;;  %v2525_v26 = vor.u32 %v2924_v21, %v2522_v23 }
 0x20a   :  { %v2549_v18 = vor.u32 %v2929_v13, %v2546_v14  ;;  %v2909_v13 = vld [vmem:[#allocation2 + $0x10c] sm:$0xf]  ;;  %v2466_v14 = vld [vmem:[#allocation2 + $0x118] sm:$0xf0] }
 0x20d   :  { %703 = vmatpush.bf16.msrb.mxu1 %v2348_v24  ;;  %v2528_v24 = vld [vmem:[#allocation2 + $0x188] sm:$0xf] }
 0x20e   :  { %v2529_v27 = vor.u32 %v2927_v25, %v2528_v24 }
 0x212   :  { %v453_v1 = vpop.permute.xlu1 %452 }
 0x213   :  { %v455_v2 = vmul.f32 %v453_v1, %v438_v38  ;;  %v2417_v38 = vld [vmem:[#allocation2 + $0x2b8] sm:$0xf0]  ;;  %v2891_v1 = vld [vmem:[#allocation2 + $0x274] sm:$0xf0] }
 0x214   :  { %v2420_v43 = vor.u32 %v2897_v37, %v2417_v38  ;;  %v2328_v37 = vor.u32 %v2878_v31, %v2327_v30  ;;  %v2879_v38 = vld [vmem:[#allocation2 + $0x214] sm:$0xf0]  ;;  %v2504_v31 = vld [vmem:[#allocation2 + $0x160] sm:$0xf] }
 0x215   :  { %457 = vrot.lane.b32.xlu2 %v455_v2, %s3140_s15  ;;  %v2889_v2 = vld [vmem:[#allocation2 + $0x26c] sm:$0xf] }
 0x216   :  { %725 = vmatpush.bf16.msrb.mxu3 %v2420_v43  ;;  %v2388_v6 = vor.u32 %v2889_v2, %v2385_v5  ;;  %v2332_v43 = vor.u32 %v2876_v33, %v2329_v34  ;;  %691 = vmatpush.bf16.msrb.mxu0 %v2328_v37  ;;  %v2562_v2 = vld [vmem:[#allocation2 + $0x1d8] sm:$0xf0]  ;;  %v2561_v5 = vor.u32 %v2935_v0, %v2560_v63  ;;  %v2920_v33 = vld [vmem:[#allocation2 + $0x164] sm:$0xf]  ;;  %v2512_v37 = vld [vmem:[#allocation2 + $0x168] sm:$0xf] }
 0x217   :  { %v2480_v63 = vld [vmem:[#allocation2 + $0x128] sm:$0xf]  ;;  %v2915_v0 = vld [vmem:[#allocation2 + $0x134] sm:$0xf0] }
 0x218   :  { %704 = vmatpush.bf16.msrb.mxu1 %v2332_v43  ;;  %v2921_v43 = vld [vmem:[#allocation2 + $0x16c] sm:$0xf] }
 0x21c   :  { %953 = vmatpush.bf16.msra.mxu1 %v2573_v57  ;;  %v2917_v57 = vld [vmem:[#allocation2 + $0x14c] sm:$0xf] }
 0x250   :  { %v338_v3 = vpop.permute.xlu0 %337 }
 0x251   :  { %v3261_v4 = vsub.f32 %v3018_v54, %v338_v3  ;;  %v2399_v54 = vld [vmem:[#allocation2 + $0x288] sm:$0xf]  ;;  %v2384_v3 = vor.u32 %v2891_v1, %v2383_v47  ;;  %v2933_v47 = vld [vmem:[#allocation2 + $0x1cc] sm:$0xf]  ;;  %v2553_v1 = vor.u32 %v2934_v61, %v2552_v60  ;;  %v2472_v60 = vld [vmem:[#allocation2 + $0x120] sm:$0xf] }
 0x252   :  { %v2400_v58 = vor.u32 %v2895_v55, %v2399_v54  ;;  %v2576_v54 = vld [vmem:[#allocation2 + $0x1e8] sm:$0xf]  ;;  %v2939_v55 = vld [vmem:[#allocation2 + $0x1f4] sm:$0xf0]  ;;  %v2565_v9 = vor.u32 %v2933_v47, %v2562_v2  ;;  %v2913_v47 = vld [vmem:[#allocation2 + $0x12c] sm:$0xf] }
 0x253   :  { %462 = vrot.lane.b32.xlu1 %v3261_v4, %s3141_s1 }
 0x254   :  { %713 = vmatpush.bf16.msrb.mxu2 %v2400_v58  ;;  %v2577_v58 = vor.u32 %v2939_v55, %v2576_v54  ;;  %v2496_v54 = vld [vmem:[#allocation2 + $0x148] sm:$0xf]  ;;  %v2919_v55 = vld [vmem:[#allocation2 + $0x154] sm:$0xf0] }
 0x258   :  { %714 = vmatpush.bf16.msrb.mxu2 %v2384_v3  ;;  %v2557_v3 = vor.u32 %v2932_v62, %v2554_v42  ;;  %v2912_v62 = vld [vmem:[#allocation2 + $0x124] sm:$0xf]  ;;  %v2474_v42 = vld [vmem:[#allocation2 + $0x130] sm:$0xf0] }
 0x25a   :  { %954 = vmatpush.bf16.msra.mxu1 %v2557_v3  ;;  %v2477_v3 = vor.u32 %v2912_v62, %v2474_v42 }
 0x25c   :  { %715 = vmatpush.bf16.msrb.mxu2 %v2368_v15 }
 0x25e   :  { %955 = vmatpush.bf16.msra.mxu1 %v2541_v16  ;;  %v2461_v16 = vor.u32 %v2908_v8, %v2458_v10 }
 0x260   :  { %716 = vmatpush.bf16.msrb.mxu2 %v2352_v28  ;;  %v2925_v28 = vld [vmem:[#allocation2 + $0x18c] sm:$0xf] }
 0x261   :  { %v2533_v30 = vor.u32 %v2925_v28, %v2530_v29 }
 0x262   :  { %956 = vmatpush.bf16.msra.mxu1 %v2525_v26 }
 0x26f   :  { %v458_v44 = vpop.permute.xlu2 %457 }
 0x270   :  { %v3266_v45 = vsub.f32 %v3247_v36, %v458_v44  ;;  %v378_v46 = vpop.permute.xlu1 %377  ;;  %v2401_v36 = vld [vmem:[#allocation2 + $0x298] sm:$0xf0]  ;;  %v2336_v44 = vor.u32 %v2879_v38, %v2335_v35  ;;  %v2506_v35 = vld [vmem:[#allocation2 + $0x170] sm:$0xf0]  ;;  %v2923_v38 = vld [vmem:[#allocation2 + $0x174] sm:$0xf0] }
 0x271   :  { %v3269_v48 = vsub.f32 %v3242_v56, %v378_v46  ;;  %v2404_v56 = vor.u32 %v2893_v59, %v2401_v36  ;;  %v2568_v46 = vld [vmem:[#allocation2 + $0x1e0] sm:$0xf]  ;;  %v2937_v59 = vld [vmem:[#allocation2 + $0x1ec] sm:$0xf]  ;;  %v2578_v36 = vld [vmem:[#allocation2 + $0x1f8] sm:$0xf0]  ;;  %v2509_v39 = vor.u32 %v2920_v33, %v2506_v35  ;;  %v2513_v40 = vor.u32 %v2923_v38, %v2512_v37 }
 0x272   :  { %470 = vrot.lane.b32.xlu0 %v3266_v45, %s3140_s15  ;;  %v2569_v52 = vor.u32 %v2938_v49, %v2568_v46  ;;  %717 = vmatpush.bf16.msrb.mxu2 %v2336_v44  ;;  %v2514_v44 = vld [vmem:[#allocation2 + $0x178] sm:$0xf0]  ;;  %v2488_v46 = vld [vmem:[#allocation2 + $0x140] sm:$0xf]  ;;  %v2453_v33 = vld [vmem:[%s3562_s4 + $0x4] sm:$0xf] }
 0x273   :  { %466 = vrot.lane.b32.xlu2 %v3269_v48, %s3142_s16  ;;  %726 = vmatpush.bf16.msrb.mxu3 %v2404_v56  ;;  %v2581_v56 = vor.u32 %v2937_v59, %v2578_v36  ;;  %v2517_v49 = vor.u32 %v2921_v43, %v2514_v44  ;;  %v2489_v53 = vor.u32 %v2918_v50, %v2488_v46  ;;  %v2498_v36 = vld [vmem:[#allocation2 + $0x158] sm:$0xf0]  ;;  %v773_v35 = vperm.slane %v2453_v33, 1 }
 0x274   :  { %940 = vmatpush.bf16.msra.mxu0 %v2569_v52  ;;  %v2490_v52 = vld [vmem:[#allocation2 + $0x150] sm:$0xf0]  ;;  %957 = vmatpush.bf16.msra.mxu1 %v2509_v39  ;;  %v2497_v59 = vor.u32 %v2919_v55, %v2496_v54  ;;  %v2501_v61 = vor.u32 %v2917_v57, %v2498_v36  ;;  %v775_v46 = vperm.slane %v2453_v33, 3 }
 0x276   :  { %966 = vmatpush.bf16.msra.mxu2 %v2577_v58 }
 0x277   :  { %727 = vmatpush.bf16.msrb.mxu3 %v2388_v6  ;;  %v2536_v6 = vld [vmem:[#allocation2 + $0x1a0] sm:$0xf] }
 0x278   :  { %941 = vmatpush.bf16.msra.mxu0 %v2553_v1  ;;  %v2537_v15 = vor.u32 %v2930_v7, %v2536_v6  ;;  %v2482_v1 = vld [vmem:[#allocation2 + $0x138] sm:$0xf0]  ;;  %v2456_v6 = vld [vmem:[#allocation2 + $0x100] sm:$0xf]  ;;  %v2910_v7 = vld [vmem:[#allocation2 + $0x10c] sm:$0xf0] }
 0x27a   :  { %967 = vmatpush.bf16.msra.mxu2 %v2561_v5  ;;  %v2481_v5 = vor.u32 %v2915_v0, %v2480_v63 }
 0x27b   :  { %728 = vmatpush.bf16.msrb.mxu3 %v2372_v19  ;;  %v2520_v19 = vld [vmem:[#allocation2 + $0x180] sm:$0xf] }
 0x27c   :  { %942 = vmatpush.bf16.msra.mxu0 %v2537_v15  ;;  %v2521_v22 = vor.u32 %v2926_v20, %v2520_v19  ;;  %v2457_v15 = vor.u32 %v2910_v7, %v2456_v6  ;;  %v418_v19 = vpop.permute.xlu0 %417 }
 0x27d   :  { %v3277_v23 = vsub.f32 %v3252_v41, %v418_v19 }
 0x27e   :  { %968 = vmatpush.bf16.msra.mxu2 %v2545_v17  ;;  %v2465_v17 = vor.u32 %v2911_v12, %v2464_v11 }
 0x27f   :  { %729 = vmatpush.bf16.msrb.mxu3 %v2356_v32  ;;  %v2922_v32 = vld [vmem:[#allocation2 + $0x16c] sm:$0xf0] }
 0x280   :  { %943 = vmatpush.bf16.msra.mxu0 %v2521_v22  ;;  %v2505_v34 = vor.u32 %v2922_v32, %v2504_v31 }
 0x282   :  { %969 = vmatpush.bf16.msra.mxu2 %v2529_v27 }
 0x283   :  { %730 = vmatpush.bf16.msrb.mxu3 %v2340_v51  ;;  %v2916_v51 = vld [vmem:[#allocation2 + $0x144] sm:$0xf] }
 0x284   :  { %944 = vmatpush.bf16.msra.mxu0 %v2505_v34  ;;  %v2493_v58 = vor.u32 %v2916_v51, %v2490_v52  ;;  %v772_v34 = vperm.slane %v2453_v33, 0 }
 0x286   :  { %970 = vmatpush.bf16.msra.mxu2 %v2513_v40  ;;  %958 = vmatpush.bf16.msra.mxu1 %v2493_v58 }
 0x287   :  { %979 = vmatpush.bf16.msra.mxu3 %v2581_v56  ;;  %v2914_v56 = vld [vmem:[#allocation2 + $0x12c] sm:$0xf0] }
 0x288   :  { %945 = vmatpush.bf16.msra.mxu0 %v2489_v53  ;;  %v2473_v2 = vor.u32 %v2914_v56, %v2472_v60 }
 0x28a   :  { %971 = vmatpush.bf16.msra.mxu2 %v2497_v59  ;;  %959 = vmatpush.bf16.msra.mxu1 %v2477_v3 }
 0x28b   :  { %980 = vmatpush.bf16.msra.mxu3 %v2565_v9  ;;  %v2485_v9 = vor.u32 %v2913_v47, %v2482_v1 }
 0x28c   :  { %946 = vmatpush.bf16.msra.mxu0 %v2473_v2 }
 0x28e   :  { %972 = vmatpush.bf16.msra.mxu2 %v2481_v5  ;;  %960 = vmatpush.bf16.msra.mxu1 %v2461_v16 }
 0x28f   :  { %981 = vmatpush.bf16.msra.mxu3 %v2549_v18  ;;  %v2469_v18 = vor.u32 %v2909_v13, %v2466_v14 }
 0x290   :  { %947 = vmatpush.bf16.msra.mxu0 %v2457_v15 }
 0x292   :  { %973 = vmatpush.bf16.msra.mxu2 %v2465_v17 }
 0x293   :  { %982 = vmatpush.bf16.msra.mxu3 %v2533_v30 }
 0x297   :  { %983 = vmatpush.bf16.msra.mxu3 %v2517_v49  ;;  %v774_v49 = vperm.slane %v2453_v33, 2 }
 0x29b   :  { %984 = vmatpush.bf16.msra.mxu3 %v2501_v61 }
 0x29f   :  { %985 = vmatpush.bf16.msra.mxu3 %v2485_v9 }
 0x2a3   :  { %986 = vmatpush.bf16.msra.mxu3 %v2469_v18 }
 0x2c5   :  { %v463_v21 = vpop.permute.xlu1 %462 }
 0x2cd   :  { %v467_v20 = vpop.permute.xlu2 %466 }
 0x2ce   :  { %v474_v22 = vsel %vm473_vm0, %v463_v21, %v467_v20 }
 0x2cf   :  { %v476_v25 = vsel %vm475_vm1, %v474_v22, %v3277_v23 }
 0x2e4   :  { %v471_v24 = vpop.permute.xlu0 %470 }
 0x2e5   :  { %v478_v26 = vsel %vm477_vm2, %v476_v25, %v471_v24 }
 0x2e6   :  { %v479_v27 = vpack.c.bf16 %v478_v26, %v478_v26 }
 0x2e8   :  { %692 = vmatmul.bf16.vlgmr.msrb.gmra.mxu0 %v479_v27  ;;  %705 = vmatmul.bf16.vlgmr.msrb.gmra.mxu1 %v479_v27 }
 0x2e9   :  { %718 = vmatmul.bf16.vlgmr.msrb.gmra.mxu2 %v479_v27  ;;  %731 = vmatmul.bf16.vlgmr.msrb.gmra.mxu3 %v479_v27 }
 0x2f8   :  { %948 = vmatmul.bf16.vlgmr.msra.gmra.mxu0 %v479_v27  ;;  %961 = vmatmul.bf16.vlgmr.msra.gmra.mxu1 %v479_v27 }
 0x2f9   :  { %974 = vmatmul.bf16.vlgmr.msra.gmra.mxu2 %v479_v27  ;;  %987 = vmatmul.bf16.vlgmr.msra.gmra.mxu3 %v479_v27 }
 0x365   :  { %v3282_v28 = vpop.f32.mrf.mxu0  ;;  %v3284_v41 = vpop.f32.mrf.mxu1 }
 0x36c   :  { %v3286_v29 = vpop.f32.mrf.mxu2  ;;  %v3288_v30 = vpop.f32.mrf.mxu3 }
 0x36d   :  { %v695_v31 = vpop.f32.mrf.mxu0  ;;  %v708_v32 = vpop.f32.mrf.mxu1 }
 0x374   :  { %v721_v37 = vpop.f32.mrf.mxu2  ;;  %v734_v38 = vpop.f32.mrf.mxu3 }
 0x375   :  { %v949_v39 = vpop.f32.mrf.mxu0  ;;  %v962_v40 = vpop.f32.mrf.mxu1 }
 0x376   :  { %v3293_v43 = vadd.f32 %v949_v39, %v772_v34  ;;  %v3295_v44 = vadd.f32 %v962_v40, %v773_v35 }
 0x378   :  { %1052 = vrot.lane.b32.xlu2 %v3295_v44, %s3140_s15  ;;  %1012 = vrot.lane.b32.xlu1 %v3293_v43, %s3140_s15  ;;  %v2583_v59 = vmul.f32 -1.442695, %v3295_v44  ;;  %v2582_v61 = vmul.f32 -1.442695, %v3293_v43 }
 0x37a   :  { %3025 = vpow2.f32 %v2583_v59 }
 0x37c   :  { %v975_v50 = vpop.f32.mrf.mxu2  ;;  %v988_v51 = vpop.f32.mrf.mxu3 }
 0x37d   :  { %v3301_v52 = vadd.f32 %v988_v51, %v775_v46  ;;  %v951_v53 = vpop.f32.mrf.mxu0  ;;  %v964_v54 = vpop.f32.mrf.mxu1  ;;  %v3303_v55 = vadd.f32 %v975_v50, %v774_v49 }
 0x37f   :  { %1132 = vrot.lane.b32.xlu0 %v3301_v52, %s3140_s15  ;;  %v2585_v63 = vmul.f32 -1.442695, %v3301_v52  ;;  %v2584_v0 = vmul.f32 -1.442695, %v3303_v55 }
 0x380   :  { %1092 = vrot.lane.b32.xlu1 %v3303_v55, %s3140_s15  ;;  %v3026_v36 = vpop.eup %3025 }
 0x381   :  { %v1035_v60 = vadd.f32 1.0, %v3026_v36 }
 0x383   :  { %3027 = vrcp.f32 %v1035_v60  ;;  %v1047_v5 = vand.u32 2147483648, %v1035_v60  ;;  %vm1041_vm4 = vweird.f32 %v1035_v60  ;;  %v1045_v6 = vand.u32 2147483647, %v1035_v60 }
 0x384   :  { %v977_v57 = vpop.f32.mrf.mxu2  ;;  %v990_v58 = vpop.f32.mrf.mxu3  ;;  %3029 = vpow2.f32 %v2582_v61 }
 0x385   :  { %3031 = vpow2.f32 %v2585_v63  ;;  %v1048_v10 = vor.u32 1.1754944e-38, %v1047_v5  ;;  %vm1046_vm6 = vcmp.eq.f32.partialorder %v1045_v6, 8.507059e+37 }
 0x386   :  { %3033 = vpow2.f32 %v2584_v0 }
 0x389   :  { %v3028_v56 = vpop.eup %3027 }
 0x38a   :  { %v1037_v62 = vmul.f32 %v3028_v56, %v1035_v60  ;;  %v3030_v47 = vpop.eup %3029  ;;  %vm1042_vm3 = vweird.f32 %v3028_v56 }
 0x38b   :  { %v995_v2 = vadd.f32 1.0, %v3030_v47  ;;  %v3032_v7 = vpop.eup %3031  ;;  %vm1043_vm5 = vmor %vm1041_vm4, %vm1042_vm3 }
 0x38c   :  { %v1038_v42 = vsub.f32 1.0, %v1037_v62  ;;  %v3034_v8 = vpop.eup %3033  ;;  %v1115_v11 = vadd.f32 1.0, %v3032_v7 }
 0x38d   :  { %3035 = vrcp.f32 %v995_v2  ;;  %v1075_v12 = vadd.f32 1.0, %v3034_v8  ;;  %v1007_v31 = vand.u32 2147483648, %v995_v2  ;;  %vm1001_vm8 = vweird.f32 %v995_v2 }
 0x38e   :  { %v1039_v1 = vmul.f32 %v3028_v56, %v1038_v42  ;;  %3037 = vrcp.f32 %v1115_v11  ;;  %v1005_v32 = vand.u32 2147483647, %v995_v2  ;;  %v1127_v49 = vand.u32 2147483648, %v1115_v11 }
 0x38f   :  { %3039 = vrcp.f32 %v1075_v12  ;;  %v1008_v37 = vor.u32 1.1754944e-38, %v1007_v31  ;;  %vm1121_vm13 = vweird.f32 %v1115_v11  ;;  %v1125_v51 = vand.u32 2147483647, %v1115_v11  ;;  %v2709_v31 = vld [vmem:[#allocation2 + $0x3e8] sm:$0xf] }
 0x390   :  { %v1040_v3 = vadd.f32 %v3028_v56, %v1039_v1  ;;  %vm1006_vm10 = vcmp.eq.f32.partialorder %v1005_v32, 8.507059e+37  ;;  %v1087_v53 = vand.u32 2147483648, %v1075_v12  ;;  %vm1081_vm15 = vweird.f32 %v1075_v12  ;;  %v2971_v32 = vld [vmem:[#allocation2 + $0x3f4] sm:$0xf0] }
 0x391   :  { %v1085_v54 = vand.u32 2147483647, %v1075_v12  ;;  %v1128_v58 = vor.u32 1.1754944e-38, %v1127_v49  ;;  %vm1126_vm4 = vcmp.eq.f32.partialorder %v1125_v51, 8.507059e+37  ;;  %v2687_v49 = vld [vmem:[#allocation2 + $0x3d0] sm:$0xf0] }
 0x392   :  { %v1044_v9 = vsel %vm1043_vm5, %v3028_v56, %v1040_v3  ;;  %v1088_v36 = vor.u32 1.1754944e-38, %v1087_v53  ;;  %v2693_v53 = vld [vmem:[#allocation2 + $0x3c8] sm:$0xf] }
 0x393   :  { %v3313_v14 = vsel %vm1046_vm6, %v1048_v10, %v1044_v9  ;;  %v3036_v16 = vpop.eup %3035  ;;  %vm1086_vm5 = vcmp.eq.f32.partialorder %v1085_v54, 8.507059e+37  ;;  %v2967_v54 = vld [vmem:[#allocation2 + $0x3d4] sm:$0xf0] }
 0x394   :  { %v997_v17 = vmul.f32 %v3036_v16, %v995_v2  ;;  %v3038_v18 = vpop.eup %3037  ;;  %vm1002_vm7 = vweird.f32 %v3036_v16 }
 0x395   :  { %v3040_v20 = vpop.eup %3039  ;;  %v1117_v21 = vmul.f32 %v3038_v18, %v1115_v11  ;;  %vm1003_vm9 = vmor %vm1001_vm8, %vm1002_vm7  ;;  %vm1122_vm11 = vweird.f32 %v3038_v18 }
 0x396   :  { %v998_v19 = vsub.f32 1.0, %v997_v17  ;;  %v1077_v24 = vmul.f32 %v3040_v20, %v1075_v12  ;;  %vm1082_vm12 = vweird.f32 %v3040_v20  ;;  %vm1123_vm14 = vmor %vm1121_vm13, %vm1122_vm11 }
 0x397   :  { %v1118_v25 = vsub.f32 1.0, %v1117_v21  ;;  %vm1083_vm3 = vmor %vm1081_vm15, %vm1082_vm12 }
 0x398   :  { %v999_v22 = vmul.f32 %v3036_v16, %v998_v19  ;;  %v1078_v27 = vsub.f32 1.0, %v1077_v24  ;;  %v2970_v24 = vld [vmem:[#allocation2 + $0x3ec] sm:$0xf0] }
 0x399   :  { %v1119_v33 = vmul.f32 %v3038_v18, %v1118_v25  ;;  %v2968_v25 = vld [vmem:[#allocation2 + $0x3e4] sm:$0xf] }
 0x39a   :  { %v1000_v26 = vadd.f32 %v3036_v16, %v999_v22  ;;  %v1079_v35 = vmul.f32 %v3040_v20, %v1078_v27  ;;  %v2701_v22 = vld [vmem:[#allocation2 + $0x3e0] sm:$0xf]  ;;  %v2703_v27 = vld [vmem:[#allocation2 + $0x3f0] sm:$0xf0] }
 0x39b   :  { %v1120_v40 = vadd.f32 %v3038_v18, %v1119_v33  ;;  %v2706_v33 = vor.u32 %v2968_v25, %v2703_v27  ;;  %v2953_v25 = vld [vmem:[#allocation2 + $0x36c] sm:$0xf] }
 0x39c   :  { %v1004_v34 = vsel %vm1003_vm9, %v3036_v16, %v1000_v26  ;;  %v1080_v50 = vadd.f32 %v3040_v20, %v1079_v35  ;;  %v2702_v26 = vor.u32 %v2970_v24, %v2701_v22  ;;  %v2969_v35 = vld [vmem:[#allocation2 + $0x3ec] sm:$0xf]  ;;  %v2645_v22 = vld [vmem:[#allocation2 + $0x368] sm:$0xf]  ;;  %v2955_v24 = vld [vmem:[#allocation2 + $0x374] sm:$0xf0] }
 0x39d   :  { %v1009_v39 = vsel %vm1006_vm10, %v1008_v37, %v1004_v34  ;;  %v1124_v57 = vsel %vm1123_vm14, %v3038_v18, %v1120_v40  ;;  %v2710_v34 = vor.u32 %v2971_v32, %v2709_v31  ;;  %v2711_v37 = vld [vmem:[#allocation2 + $0x3f8] sm:$0xf0]  ;;  %v2966_v40 = vld [vmem:[#allocation2 + $0x3cc] sm:$0xf0]  ;;  %1385 = vmatpush.bf16.msrb.mxu1 %v2706_v33  ;;  %v2646_v32 = vor.u32 %v2955_v24, %v2645_v22  ;;  %v2621_v33 = vld [vmem:[#allocation2 + $0x340] sm:$0xf] }
 0x39e   :  { %v1084_v59 = vsel %vm1083_vm3, %v3040_v20, %v1080_v50  ;;  %v1129_v56 = vsel %vm1126_vm4, %v1128_v58, %v1124_v57  ;;  %1372 = vmatpush.bf16.msrb.mxu0 %v2702_v26  ;;  %v2965_v57 = vld [vmem:[#allocation2 + $0x3cc] sm:$0xf]  ;;  %v2694_v58 = vor.u32 %v2967_v54, %v2693_v53  ;;  %v2647_v26 = vld [vmem:[#allocation2 + $0x378] sm:$0xf0]  ;;  %v2605_v54 = vld [vmem:[#allocation2 + $0x320] sm:$0xf] }
 0x39f   :  { %v1089_v62 = vsel %vm1086_vm5, %v1088_v36, %v1084_v59  ;;  %1398 = vmatpush.bf16.msrb.mxu2 %v2710_v34  ;;  %v2695_v59 = vld [vmem:[#allocation2 + $0x3d8] sm:$0xf0]  ;;  %v2669_v36 = vld [vmem:[#allocation2 + $0x3a0] sm:$0xf]  ;;  %v2950_v34 = vld [vmem:[#allocation2 + $0x34c] sm:$0xf0] }
 0x3a3   :  { %1399 = vmatpush.bf16.msrb.mxu2 %v2694_v58  ;;  %v2944_v58 = vld [vmem:[#allocation2 + $0x324] sm:$0xf] }
 0x3d2   :  { %v1053_v13 = vpop.permute.xlu2 %1052 }
 0x3d3   :  { %v1055_v15 = vmul.f32 %v1053_v13, %v3313_v14 }
 0x3d5   :  { %1057 = vrot.lane.b32.xlu0 %v1055_v15, %s3141_s1 }
 0x3ea   :  { %v1013_v38 = vpop.permute.xlu1 %1012 }
 0x3eb   :  { %v1015_v46 = vmul.f32 %v1013_v38, %v1009_v39  ;;  %v2685_v38 = vld [vmem:[#allocation2 + $0x3c0] sm:$0xf] }
 0x3ec   :  { %v2686_v50 = vor.u32 %v2966_v40, %v2685_v38  ;;  %v2623_v38 = vld [vmem:[#allocation2 + $0x350] sm:$0xf0]  ;;  %v2951_v40 = vld [vmem:[#allocation2 + $0x354] sm:$0xf0] }
 0x3ed   :  { %1017 = vrot.lane.b32.xlu2 %v1015_v46, %s3141_s1  ;;  %v2964_v46 = vld [vmem:[#allocation2 + $0x3c4] sm:$0xf] }
 0x3ee   :  { %v2690_v51 = vor.u32 %v2964_v46, %v2687_v49  ;;  %1373 = vmatpush.bf16.msrb.mxu0 %v2686_v50  ;;  %v2949_v46 = vld [vmem:[#allocation2 + $0x34c] sm:$0xf]  ;;  %v2631_v49 = vld [vmem:[#allocation2 + $0x358] sm:$0xf0]  ;;  %v2622_v50 = vor.u32 %v2950_v34, %v2621_v33  ;;  %v3374_v34 = vld [vmem:[%s3562_s4 + $0x8] sm:$0xf] }
 0x3f0   :  { %1386 = vmatpush.bf16.msrb.mxu1 %v2690_v51 }
 0x3f1   :  { %v1133_v60 = vpop.permute.xlu0 %1132 }
 0x3f2   :  { %v1135_v61 = vmul.f32 %v1133_v60, %v1129_v56  ;;  %v1093_v42 = vpop.permute.xlu1 %1092  ;;  %v2962_v60 = vld [vmem:[#allocation2 + $0x3ac] sm:$0xf0] }
 0x3f3   :  { %v1095_v63 = vmul.f32 %v1093_v42, %v1089_v62  ;;  %v2677_v42 = vld [vmem:[#allocation2 + $0x3a8] sm:$0xf] }
 0x3f4   :  { %1137 = vrot.lane.b32.xlu1 %v1135_v61, %s3141_s1  ;;  %v2960_v61 = vld [vmem:[#allocation2 + $0x3a4] sm:$0xf] }
 0x3f5   :  { %1097 = vrot.lane.b32.xlu2 %v1095_v63, %s3141_s1  ;;  %v2670_v63 = vor.u32 %v2962_v60, %v2669_v36  ;;  %v2607_v36 = vld [vmem:[#allocation2 + $0x330] sm:$0xf0]  ;;  %v2613_v60 = vld [vmem:[#allocation2 + $0x328] sm:$0xf] }
 0x3f7   :  { %1374 = vmatpush.bf16.msrb.mxu0 %v2670_v63  ;;  %v2610_v63 = vor.u32 %v2944_v58, %v2607_v36 }
 0x447   :  { %v1058_v0 = vpop.permute.xlu0 %1057  ;;  %v1018_v47 = vpop.permute.xlu2 %1017 }
 0x448   :  { %v1060_v1 = vadd.f32 %v1058_v0, %v3295_v44  ;;  %v1020_v2 = vadd.f32 %v1018_v47, %v3293_v43  ;;  %v2963_v0 = vld [vmem:[#allocation2 + $0x3b4] sm:$0xf0]  ;;  %v2961_v47 = vld [vmem:[#allocation2 + $0x3ac] sm:$0xf] }
 0x44a   :  { %3041 = vtanh.f32 %v1060_v1  ;;  %v2679_v1 = vld [vmem:[#allocation2 + $0x3b8] sm:$0xf0] }
 0x44b   :  { %3043 = vtanh.f32 %v1020_v2 }
 0x44f   :  { %v1098_v3 = vpop.permute.xlu2 %1097 }
 0x450   :  { %v3042_v5 = vpop.eup %3041  ;;  %v1100_v6 = vadd.f32 %v1098_v3, %v3303_v55  ;;  %v2678_v3 = vor.u32 %v2963_v0, %v2677_v42 }
 0x451   :  { %v3044_v7 = vpop.eup %3043  ;;  %1063 = vrot.lane.b32.xlu1 %v3042_v5, %s3142_s16 }
 0x452   :  { %3045 = vtanh.f32 %v1100_v6  ;;  %1023 = vrot.lane.b32.xlu0 %v3044_v7, %s3142_s16  ;;  %v2958_v6 = vld [vmem:[#allocation2 + $0x38c] sm:$0xf0]  ;;  %1400 = vmatpush.bf16.msrb.mxu2 %v2678_v3  ;;  %v2940_v3 = vld [vmem:[#allocation2 + $0x304] sm:$0xf] }
 0x458   :  { %v3325_v8 = vpop.eup %3045 }
 0x45a   :  { %1103 = vrot.lane.b32.xlu0 %v3325_v8, %s3142_s16 }
 0x466   :  { %v1138_v44 = vpop.permute.xlu1 %1137 }
 0x467   :  { %v1140_v43 = vadd.f32 %v1138_v44, %v3301_v52  ;;  %v2682_v44 = vor.u32 %v2961_v47, %v2679_v1  ;;  %v2589_v1 = vld [vmem:[#allocation2 + $0x300] sm:$0xf] }
 0x469   :  { %3047 = vtanh.f32 %v1140_v43  ;;  %v2655_v43 = vld [vmem:[#allocation2 + $0x390] sm:$0xf0] }
 0x46f   :  { %v3048_v9 = vpop.eup %3047 }
 0x470   :  { %1143 = vrot.lane.b32.xlu2 %v3048_v9, %s3142_s16 }
 0x4c3   :  { %v1064_v10 = vpop.permute.xlu1 %1063 }
 0x4c4   :  { %v1066_v55 = vmul.f32 %v1064_v10, %v3313_v14  ;;  %v1024_v11 = vpop.permute.xlu0 %1023  ;;  %v2959_v10 = vld [vmem:[#allocation2 + $0x394] sm:$0xf0] }
 0x4c5   :  { %v1026_v12 = vmul.f32 %v1024_v11, %v1009_v39  ;;  %v2714_v39 = vor.u32 %v2969_v35, %v2711_v37  ;;  %v2663_v11 = vld [vmem:[#allocation2 + $0x398] sm:$0xf0]  ;;  %v2948_v35 = vld [vmem:[#allocation2 + $0x344] sm:$0xf]  ;;  %v2650_v37 = vor.u32 %v2953_v25, %v2647_v26  ;;  %v2720_v26 = vld [vmem:[%s3558_s0 + $0x8] sm:$0xff] }
 0x4c6   :  { %1068 = vrot.lane.b32.xlu2 %v1066_v55, %s3140_s15  ;;  %v2957_v55 = vld [vmem:[#allocation2 + $0x38c] sm:$0xf]  ;;  %v2626_v51 = vor.u32 %v2948_v35, %v2623_v38  ;;  %v516_v38 = vperm.slane %v3374_v34, 0 }
 0x4c7   :  { %1028 = vrot.lane.b32.xlu1 %v1026_v12, %s3140_s15  ;;  %1411 = vmatpush.bf16.msrb.mxu3 %v2714_v39  ;;  %v2629_v39 = vld [vmem:[#allocation2 + $0x348] sm:$0xf] }
 0x4c8   :  { %v2630_v53 = vor.u32 %v2951_v40, %v2629_v39  ;;  %v694_v39 = vadd.f32 %v3282_v28, %v516_v38 }
 0x4ca   :  { %v1144_v13 = vpop.permute.xlu2 %1143 }
 0x4cb   :  { %v1146_v15 = vmul.f32 %v1144_v13, %v1129_v56  ;;  %v2698_v56 = vor.u32 %v2965_v57, %v2695_v59  ;;  %v2946_v57 = vld [vmem:[#allocation2 + $0x32c] sm:$0xf0]  ;;  %v2634_v59 = vor.u32 %v2949_v46, %v2631_v49 }
 0x4cc   :  { %v1104_v16 = vpop.permute.xlu0 %1103  ;;  %v2606_v42 = vor.u32 %v2946_v57, %v2605_v54 }
 0x4cd   :  { %v1106_v17 = vmul.f32 %v1104_v16, %v1089_v62  ;;  %1148 = vrot.lane.b32.xlu0 %v1146_v15, %s3140_s15  ;;  %v2671_v62 = vld [vmem:[#allocation2 + $0x3b0] sm:$0xf0]  ;;  %1412 = vmatpush.bf16.msrb.mxu3 %v2698_v56  ;;  %v2637_v16 = vld [vmem:[#allocation2 + $0x360] sm:$0xf]  ;;  %v2947_v56 = vld [vmem:[#allocation2 + $0x334] sm:$0xf0] }
 0x4ce   :  { %v2674_v2 = vor.u32 %v2960_v61, %v2671_v62  ;;  %v2945_v61 = vld [vmem:[#allocation2 + $0x32c] sm:$0xf]  ;;  %v2615_v62 = vld [vmem:[#allocation2 + $0x338] sm:$0xf0]  ;;  %v2614_v0 = vor.u32 %v2947_v56, %v2613_v60 }
 0x4cf   :  { %1108 = vrot.lane.b32.xlu1 %v1106_v17, %s3140_s15  ;;  %v2954_v17 = vld [vmem:[#allocation2 + $0x36c] sm:$0xf0]  ;;  %v2618_v47 = vor.u32 %v2945_v61, %v2615_v62 }
 0x4d0   :  { %1387 = vmatpush.bf16.msrb.mxu1 %v2674_v2  ;;  %v2638_v27 = vor.u32 %v2954_v17, %v2637_v16  ;;  %v2942_v2 = vld [vmem:[#allocation2 + $0x30c] sm:$0xf0] }
 0x4d1   :  { %1413 = vmatpush.bf16.msrb.mxu3 %v2682_v44  ;;  %v2943_v44 = vld [vmem:[#allocation2 + $0x314] sm:$0xf0] }
 0x520   :  { %v1069_v52 = vpop.permute.xlu2 %1068 }
 0x521   :  { %v3336_v18 = vsub.f32 %v3042_v5, %v1069_v52  ;;  %v2653_v5 = vld [vmem:[#allocation2 + $0x380] sm:$0xf]  ;;  %v2952_v52 = vld [vmem:[#allocation2 + $0x364] sm:$0xf] }
 0x522   :  { %v2654_v12 = vor.u32 %v2958_v6, %v2653_v5  ;;  %v2590_v5 = vor.u32 %v2942_v2, %v2589_v1  ;;  %v2591_v6 = vld [vmem:[#allocation2 + $0x310] sm:$0xf0] }
 0x523   :  { %1157 = vrot.lane.b32.xlu0 %v3336_v18, %s3142_s16 }
 0x524   :  { %1375 = vmatpush.bf16.msrb.mxu0 %v2654_v12  ;;  %v2975_v12 = vld [vmem:[%s3563_s5 + $0x8] sm:$0xff] }
 0x528   :  { %1376 = vmatpush.bf16.msrb.mxu0 %v2638_v27  ;;  %v1441_v27 = vpack.c.bf16 %v2720_v26, %v2720_v26 }
 0x52c   :  { %1377 = vmatpush.bf16.msrb.mxu0 %v2622_v50 }
 0x530   :  { %1378 = vmatpush.bf16.msrb.mxu0 %v2606_v42 }
 0x534   :  { %1379 = vmatpush.bf16.msrb.mxu0 %v2590_v5 }
 0x538   :  { %1467 = vmatpush.bf16.msra.mxu0 %v2975_v12 }
 0x539   :  { %v1029_v14 = vpop.permute.xlu1 %1028 }
 0x53a   :  { %v3340_v19 = vsub.f32 %v3044_v7, %v1029_v14  ;;  %v2956_v7 = vld [vmem:[#allocation2 + $0x384] sm:$0xf]  ;;  %v2666_v14 = vor.u32 %v2957_v55, %v2663_v11  ;;  %v2599_v55 = vld [vmem:[#allocation2 + $0x318] sm:$0xf0] }
 0x53b   :  { %v2658_v13 = vor.u32 %v2956_v7, %v2655_v43  ;;  %v2597_v7 = vld [vmem:[#allocation2 + $0x308] sm:$0xf]  ;;  %v2594_v43 = vor.u32 %v2940_v3, %v2591_v6 }
 0x53c   :  { %1153 = vrot.lane.b32.xlu2 %v3340_v19, %s3141_s1  ;;  %1414 = vmatpush.bf16.msrb.mxu3 %v2666_v14 }
 0x53d   :  { %1388 = vmatpush.bf16.msrb.mxu1 %v2658_v13  ;;  %v2974_v13 = vld [vmem:[%s3563_s5] sm:$0xff] }
 0x53e   :  { %1468 = vmatpush.bf16.msra.mxu0 %v2974_v13 }
 0x53f   :  { %v1149_v20 = vpop.permute.xlu0 %1148 }
 0x540   :  { %v3344_v21 = vsub.f32 %v3048_v9, %v1149_v20  ;;  %v2661_v9 = vld [vmem:[#allocation2 + $0x388] sm:$0xf]  ;;  %v2639_v20 = vld [vmem:[#allocation2 + $0x370] sm:$0xf0]  ;;  %1415 = vmatpush.bf16.msrb.mxu3 %v2650_v37 }
 0x541   :  { %v2662_v15 = vor.u32 %v2959_v10, %v2661_v9  ;;  %v2642_v31 = vor.u32 %v2952_v52, %v2639_v20  ;;  %v2598_v9 = vor.u32 %v2943_v44, %v2597_v7  ;;  %v2941_v10 = vld [vmem:[#allocation2 + $0x30c] sm:$0xf]  ;;  %v2977_v44 = vld [vmem:[%s3563_s5 + $0x18] sm:$0xff] }
 0x542   :  { %1161 = vrot.lane.b32.xlu1 %v3344_v21, %s3140_s15  ;;  %v2602_v11 = vor.u32 %v2941_v10, %v2599_v55 }
 0x543   :  { %1401 = vmatpush.bf16.msrb.mxu2 %v2662_v15  ;;  %1389 = vmatpush.bf16.msrb.mxu1 %v2642_v31  ;;  %v1109_v15 = vpop.permute.xlu1 %1108 }
 0x544   :  { %1416 = vmatpush.bf16.msrb.mxu3 %v2634_v59  ;;  %v3356_v14 = vsub.f32 %v3325_v8, %v1109_v15 }
 0x547   :  { %1402 = vmatpush.bf16.msrb.mxu2 %v2646_v32  ;;  %1390 = vmatpush.bf16.msrb.mxu1 %v2626_v51 }
 0x548   :  { %1417 = vmatpush.bf16.msrb.mxu3 %v2618_v47 }
 0x54b   :  { %1403 = vmatpush.bf16.msrb.mxu2 %v2630_v53  ;;  %1391 = vmatpush.bf16.msrb.mxu1 %v2610_v63 }
 0x54c   :  { %1418 = vmatpush.bf16.msrb.mxu3 %v2602_v11  ;;  %v3394_v11 = vld [vmem:[%s3562_s4 + $0xc] sm:$0xf] }
 0x54d   :  { %v1204_v12 = vperm.slane %v3394_v11, 0 }
 0x54f   :  { %1404 = vmatpush.bf16.msrb.mxu2 %v2614_v0  ;;  %1392 = vmatpush.bf16.msrb.mxu1 %v2594_v43  ;;  %v2976_v43 = vld [vmem:[%s3563_s5 + $0x10] sm:$0xff] }
 0x553   :  { %1405 = vmatpush.bf16.msrb.mxu2 %v2598_v9  ;;  %1545 = vmatpush.bf16.msra.mxu1 %v2977_v44 }
 0x557   :  { %1546 = vmatpush.bf16.msra.mxu1 %v2976_v43 }
 0x595   :  { %v1158_v16 = vpop.permute.xlu0 %1157 }
 0x596   :  { %v1154_v17 = vpop.permute.xlu2 %1153 }
 0x597   :  { %v1164_v52 = vsel %vm473_vm0, %v1154_v17, %v1158_v16 }
 0x598   :  { %v1165_v22 = vsel %vm475_vm1, %v1164_v52, %v3356_v14 }
 0x5b4   :  { %v1162_v20 = vpop.permute.xlu1 %1161 }
 0x5b5   :  { %v1166_v24 = vsel %vm477_vm2, %v1165_v22, %v1162_v20 }
 0x5b6   :  { %v1167_v25 = vpack.c.bf16 %v1166_v24, %v1166_v24 }
 0x5b8   :  { %1380 = vmatmul.bf16.vlgmr.msrb.gmra.mxu0 %v1167_v25  ;;  %1393 = vmatmul.bf16.vlgmr.msrb.gmra.mxu1 %v1167_v25 }
 0x5b9   :  { %1406 = vmatmul.bf16.vlgmr.msrb.gmra.mxu2 %v1167_v25  ;;  %1419 = vmatmul.bf16.vlgmr.msrb.gmra.mxu3 %v1167_v25 }
 0x5c8   :  { %2729 = vmatmul.msk.bf16.vlgmr.msra.gmra.mxu0 %vm473_vm0, %v1441_v27 }
 0x635   :  { %v1381_v8 = vpop.f32.mrf.mxu0  ;;  %v3365_v31 = vpop.f32.mrf.mxu1 }
 0x636   :  { %v1382_v13 = vadd.f32 %v1381_v8, %v1204_v12 }
 0x63c   :  { %v3367_v32 = vpop.f32.mrf.mxu2  ;;  %v3369_v33 = vpop.f32.mrf.mxu3 }
 0x63d   :  { %v1383_v35 = vpop.f32.mrf.mxu0  ;;  %v1396_v37 = vpop.f32.mrf.mxu1 }
 0x644   :  { %v1409_v40 = vpop.f32.mrf.mxu2  ;;  %v1422_v46 = vpop.f32.mrf.mxu3 }
 0x645   :  { %v1470_v49 = vpop.f32.mrf.mxu0 }
 0x646   :  { %v1471_v50 = vadd.f32 %v1470_v49, %v694_v39 }
 0x648   :  { %1494 = vrot.lane.b32.xlu2 %v1471_v50, %s3140_s15  ;;  %v2730_v53 = vmul.f32 -1.442695, %v1471_v50 }
 0x64a   :  { %3049 = vpow2.f32 %v2730_v53 }
 0x64d   :  { %v1472_v51 = vpop.f32.mrf.mxu0 }
 0x650   :  { %v3050_v54 = vpop.eup %3049 }
 0x651   :  { %v1477_v57 = vadd.f32 1.0, %v3050_v54 }
 0x653   :  { %3051 = vrcp.f32 %v1477_v57  ;;  %v1489_v61 = vand.u32 2147483648, %v1477_v57  ;;  %vm1483_vm2 = vweird.f32 %v1477_v57  ;;  %v1487_v28 = vand.u32 2147483647, %v1477_v57 }
 0x655   :  { %v1490_v42 = vor.u32 1.1754944e-38, %v1489_v61  ;;  %vm1488_vm7 = vcmp.eq.f32.partialorder %v1487_v28, 8.507059e+37 }
 0x659   :  { %v3052_v58 = vpop.eup %3051 }
 0x65a   :  { %v1479_v59 = vmul.f32 %v3052_v58, %v1477_v57  ;;  %vm1484_vm1 = vweird.f32 %v3052_v58 }
 0x65b   :  { %vm1485_vm6 = vmor %vm1483_vm2, %vm1484_vm1 }
 0x65c   :  { %v1480_v36 = vsub.f32 1.0, %v1479_v59  ;;  %v2979_v59 = vld [vmem:[%s3563_s5 + $0x28] sm:$0xff] }
 0x65d   :  { %1657 = vmatpush.bf16.msra.mxu3 %v2979_v59 }
 0x65e   :  { %v1481_v60 = vmul.f32 %v3052_v58, %v1480_v36  ;;  %v3408_v36 = vld [vmem:[%s3563_s5 + $0x88] sm:$0xff] }
 0x65f   :  { %1621 = vmatpush.bf16.msra.mxu2 %v3408_v36  ;;  %1796 = vmatpush.bf16.msrb.mxu1 %v3408_v36 }
 0x660   :  { %v1482_v56 = vadd.f32 %v3052_v58, %v1481_v60  ;;  %v3417_v60 = vld [vmem:[%s3563_s5 + $0x80] sm:$0xff] }
 0x662   :  { %v1486_v62 = vsel %vm1485_vm6, %v3052_v58, %v1482_v56 }
 0x663   :  { %v1491_v0 = vsel %vm1488_vm7, %v1490_v42, %v1486_v62  ;;  %1622 = vmatpush.bf16.msra.mxu2 %v3417_v60  ;;  %1797 = vmatpush.bf16.msrb.mxu1 %v3417_v60  ;;  %v517_v42 = vperm.slane %v3374_v34, 1 }
 0x6a2   :  { %v1495_v63 = vpop.permute.xlu2 %1494 }
 0x6a3   :  { %v1497_v47 = vmul.f32 %v1495_v63, %v1491_v0  ;;  %v707_v63 = vadd.f32 %v3284_v41, %v517_v42 }
 0x6a5   :  { %1499 = vrot.lane.b32.xlu0 %v1497_v47, %s3141_s1 }
 0x717   :  { %v1500_v1 = vpop.permute.xlu0 %1499 }
 0x718   :  { %v1502_v2 = vadd.f32 %v1500_v1, %v1471_v50 }
 0x71a   :  { %3053 = vtanh.f32 %v1502_v2 }
 0x720   :  { %v3054_v3 = vpop.eup %3053 }
 0x721   :  { %v1504_v5 = vsub.f32 %v3261_v4, %v3054_v3 }
 0x723   :  { %1506 = vrot.lane.b32.xlu1 %v1504_v5, %s3142_s16 }
 0x795   :  { %v1507_v6 = vpop.permute.xlu1 %1506 }
 0x796   :  { %v1509_v7 = vmul.f32 %v1507_v6, %v1491_v0 }
 0x798   :  { %1511 = vrot.lane.b32.xlu2 %v1509_v7, %s3140_s15 }
 0x7f2   :  { %v1512_v9 = vpop.permute.xlu2 %1511 }
 0x7f3   :  { %v1514_v10 = vadd.f32 %v3054_v3, %v1512_v9 }
 0x7f5   :  { %v1515_v55 = vpack.c.bf16 %v1514_v10, %v1514_v10 }
 0x7f7   :  { %1522 = vrot.lane.b32.xlu0 %v1515_v55, %s3141_s1 }
 0x869   :  { %v1523_v4 = vpop.permute.xlu0 %1522 }
 0x86a   :  { %2743 = vmatmul.msk.bf16.vlgmr.msra.gmra.mxu1 %vm473_vm0, %v1523_v4 }
 0x8e7   :  { %v1548_v15 = vpop.f32.mrf.mxu1 }
 0x8e8   :  { %v1549_v16 = vadd.f32 %v1548_v15, %v1382_v13 }
 0x8ea   :  { %1572 = vrot.lane.b32.xlu1 %v1549_v16, %s3140_s15  ;;  %v2744_v52 = vmul.f32 -1.442695, %v1549_v16 }
 0x8ec   :  { %3055 = vpow2.f32 %v2744_v52 }
 0x8ef   :  { %v1550_v17 = vpop.f32.mrf.mxu1 }
 0x8f2   :  { %v3056_v20 = vpop.eup %3055 }
 0x8f3   :  { %v1555_v22 = vadd.f32 1.0, %v3056_v20 }
 0x8f5   :  { %3057 = vrcp.f32 %v1555_v22  ;;  %v1567_v37 = vand.u32 2147483648, %v1555_v22  ;;  %vm1561_vm9 = vweird.f32 %v1555_v22  ;;  %v1565_v38 = vand.u32 2147483647, %v1555_v22 }
 0x8f7   :  { %v1568_v39 = vor.u32 1.1754944e-38, %v1567_v37  ;;  %vm1566_vm11 = vcmp.eq.f32.partialorder %v1565_v38, 8.507059e+37 }
 0x8fb   :  { %v3058_v24 = vpop.eup %3057 }
 0x8fc   :  { %v1557_v25 = vmul.f32 %v3058_v24, %v1555_v22  ;;  %vm1562_vm8 = vweird.f32 %v3058_v24 }
 0x8fd   :  { %vm1563_vm10 = vmor %vm1561_vm9, %vm1562_vm8 }
 0x8fe   :  { %v1558_v26 = vsub.f32 1.0, %v1557_v25 }
 0x900   :  { %v1559_v27 = vmul.f32 %v3058_v24, %v1558_v26 }
 0x902   :  { %v1560_v35 = vadd.f32 %v3058_v24, %v1559_v27  ;;  %v2981_v27 = vld [vmem:[%s3563_s5 + $0x38] sm:$0xff] }
 0x903   :  { %1735 = vmatpush.bf16.msrb.mxu0 %v2981_v27 }
 0x904   :  { %v1564_v8 = vsel %vm1563_vm10, %v3058_v24, %v1560_v35  ;;  %v2980_v35 = vld [vmem:[%s3563_s5 + $0x30] sm:$0xff] }
 0x905   :  { %v1569_v46 = vsel %vm1566_vm11, %v1568_v39, %v1564_v8  ;;  %v1205_v39 = vperm.slane %v3394_v11, 1 }
 0x907   :  { %1736 = vmatpush.bf16.msrb.mxu0 %v2980_v35 }
 0x90b   :  { %1971 = vmatpush.bf16.msra.mxu0 %v3408_v36 }
 0x90f   :  { %1972 = vmatpush.bf16.msra.mxu0 %v3417_v60 }
 0x95c   :  { %v1573_v40 = vpop.permute.xlu1 %1572 }
 0x95d   :  { %v1575_v49 = vmul.f32 %v1573_v40, %v1569_v46  ;;  %v1395_v40 = vadd.f32 %v3365_v31, %v1205_v39 }
 0x95f   :  { %1577 = vrot.lane.b32.xlu2 %v1575_v49, %s3141_s1 }
 0x9b9   :  { %v1578_v50 = vpop.permute.xlu2 %1577 }
 0x9ba   :  { %v1580_v51 = vadd.f32 %v1578_v50, %v1549_v16 }
 0x9bc   :  { %3059 = vtanh.f32 %v1580_v51 }
 0x9c2   :  { %v3060_v53 = vpop.eup %3059 }
 0x9c3   :  { %v1582_v54 = vsub.f32 %v3340_v19, %v3060_v53  ;;  %v2978_v19 = vld [vmem:[%s3563_s5 + $0x20] sm:$0xff] }
 0x9c4   :  { %1658 = vmatpush.bf16.msra.mxu3 %v2978_v19 }
 0x9c5   :  { %1584 = vrot.lane.b32.xlu0 %v1582_v54, %s3142_s16 }
 0xa37   :  { %v1585_v57 = vpop.permute.xlu0 %1584 }
 0xa38   :  { %v1587_v58 = vmul.f32 %v1585_v57, %v1569_v46 }
 0xa3a   :  { %1589 = vrot.lane.b32.xlu1 %v1587_v58, %s3140_s15 }
 0xaac   :  { %v1590_v56 = vpop.permute.xlu1 %1589 }
 0xaad   :  { %v1592_v61 = vadd.f32 %v3060_v53, %v1590_v56 }
 0xaaf   :  { %v1593_v28 = vpack.c.bf16 %v1592_v61, %v1592_v61 }
 0xab1   :  { %1598 = vrot.lane.b32.xlu2 %v1593_v28, %s3141_s1 }
 0xb0b   :  { %v1599_v62 = vpop.permute.xlu2 %1598 }
 0xb0c   :  { %2753 = vmatmul.msk.bf16.vlgmr.msra.gmra.mxu2 %vm473_vm0, %v1599_v62  ;;  %2767 = vmatmul.msk.bf16.vlgmr.msra.gmra.mxu3 %vm473_vm0, %v1599_v62 }
 0xb8f   :  { %v3427_v0 = vpop.f32.mrf.mxu2  ;;  %v1660_v47 = vpop.f32.mrf.mxu3 }
 0xb90   :  { %v1661_v1 = vadd.f32 %v1660_v47, %v707_v63 }
 0xb92   :  { %1684 = vrot.lane.b32.xlu0 %v1661_v1, %s3140_s15  ;;  %v2768_v5 = vmul.f32 -1.442695, %v1661_v1 }
 0xb94   :  { %3061 = vpow2.f32 %v2768_v5 }
 0xb97   :  { %v1626_v2 = vpop.f32.mrf.mxu2  ;;  %v1662_v3 = vpop.f32.mrf.mxu3 }
 0xb9a   :  { %v3062_v6 = vpop.eup %3061 }
 0xb9b   :  { %v1667_v7 = vadd.f32 1.0, %v3062_v6 }
 0xb9d   :  { %3063 = vrcp.f32 %v1667_v7  ;;  %v1679_v41 = vand.u32 2147483648, %v1667_v7  ;;  %vm1673_vm13 = vweird.f32 %v1667_v7  ;;  %v1677_v4 = vand.u32 2147483647, %v1667_v7 }
 0xb9f   :  { %v1680_v13 = vor.u32 1.1754944e-38, %v1679_v41  ;;  %vm1678_vm15 = vcmp.eq.f32.partialorder %v1677_v4, 8.507059e+37  ;;  %v1424_v41 = vlaneseq  ;;  %v3463_v4 = vld [vmem:[%s3564_s6] ss:$0 sm:$0xff] }
 0xba3   :  { %v3064_v44 = vpop.eup %3063 }
 0xba4   :  { %v1669_v43 = vmul.f32 %v3064_v44, %v1667_v7  ;;  %vm1674_vm12 = vweird.f32 %v3064_v44 }
 0xba5   :  { %vm1675_vm14 = vmor %vm1673_vm13, %vm1674_vm12 }
 0xba6   :  { %v1670_v9 = vsub.f32 1.0, %v1669_v43  ;;  %v2982_v43 = vld [vmem:[%s3563_s5 + $0x40] sm:$0xff] }
 0xba8   :  { %v1671_v10 = vmul.f32 %v3064_v44, %v1670_v9 }
 0xbaa   :  { %v1672_v55 = vadd.f32 %v3064_v44, %v1671_v10 }
 0xbac   :  { %v1676_v12 = vsel %vm1675_vm14, %v3064_v44, %v1672_v55  ;;  %v2983_v44 = vld [vmem:[%s3563_s5 + $0x48] sm:$0xff] }
 0xbad   :  { %v1681_v16 = vsel %vm1678_vm15, %v1680_v13, %v1676_v12  ;;  %1832 = vmatpush.bf16.msrb.mxu2 %v2983_v44  ;;  %v1425_v12 = vshrl.u32 %v1424_v41, 7  ;;  %v1427_v13 = vand.u32 127, %v1424_v41 }
 0xbaf   :  { %vm1428_vm2 = vcmp.lt.s32.totalorder %v1425_v12, 4  ;;  %vm1429_vm6 = vcmp.lt.s32.totalorder %v1427_v13, 16 }
 0xbb0   :  { %vm1430_vm7 = vmand %vm1428_vm2, %vm1429_vm6 }
 0xbb1   :  { %1833 = vmatpush.bf16.msrb.mxu2 %v2982_v43 }
 0xc04   :  { %v1685_v15 = vpop.permute.xlu0 %1684 }
 0xc05   :  { %v1687_v17 = vmul.f32 %v1685_v15, %v1681_v16  ;;  %v1625_v15 = vadd.f32 %v3463_v4, %v3427_v0  ;;  %v3143_v0 = vmov 0.0  }
 0xc06   :  { %v3475_v27 = vsel %vm1430_vm7, 1.0, %v3143_v0 }
 0xc07   :  { %1689 = vrot.lane.b32.xlu1 %v1687_v17, %s3141_s1 }
 0xc79   :  { %v1690_v52 = vpop.permute.xlu1 %1689 }
 0xc7a   :  { %v1692_v20 = vadd.f32 %v1690_v52, %v1661_v1 }
 0xc7c   :  { %3065 = vtanh.f32 %v1692_v20  ;;  %v2784_v20 = vld [vmem:[%s3558_s0 + $0x18] sm:$0xff] }
 0xc82   :  { %v3066_v22 = vpop.eup %3065 }
 0xc83   :  { %v1694_v24 = vsub.f32 %v3269_v48, %v3066_v22 }
 0xc85   :  { %1696 = vrot.lane.b32.xlu2 %v1694_v24, %s3142_s16 }
 0xcdf   :  { %v1697_v25 = vpop.permute.xlu2 %1696 }
 0xce0   :  { %v1699_v26 = vmul.f32 %v1697_v25, %v1681_v16  ;;  %v2754_v16 = vld [vmem:[%s3558_s0 + $0x10] sm:$0xff] }
 0xce1   :  { %v1630_v17 = vsub.f32 %v1625_v15, %v2754_v16 }
 0xce2   :  { %1701 = vrot.lane.b32.xlu0 %v1699_v26, %s3140_s15 }
 0xce3   :  { %v1631_v25 = vmul.f32 %v1630_v17, %v1630_v17 }
 0xd54   :  { %v1702_v48 = vpop.permute.xlu0 %1701 }
 0xd55   :  { %v1704_v37 = vadd.f32 %v3066_v22, %v1702_v48  ;;  %v518_v22 = vperm.slane %v3374_v34, 2 }
 0xd57   :  { %v1705_v38 = vpack.c.bf16 %v1704_v37, %v1704_v37  ;;  %v720_v35 = vadd.f32 %v3286_v29, %v518_v22 }
 0xd59   :  { %1712 = vrot.lane.b32.xlu1 %v1705_v38, %s3141_s1  ;;  %v1632_v38 = vmul.f32 %v3475_v27, %v1631_v25 }
 0xdcb   :  { %v1713_v8 = vpop.permute.xlu1 %1712 }
 0xdcc   :  { %2781 = vmatmul.msk.bf16.vlgmr.msrb.gmra.mxu0 %vm473_vm0, %v1713_v8 }
 0xe49   :  { %v1738_v46 = vpop.f32.mrf.mxu0 }
 0xe4a   :  { %v1739_v49 = vadd.f32 %v1738_v46, %v1395_v40 }
 0xe4c   :  { %1762 = vrot.lane.b32.xlu2 %v1739_v49, %s3140_s15  ;;  %v2782_v51 = vmul.f32 -1.442695, %v1739_v49 }
 0xe4e   :  { %3067 = vpow2.f32 %v2782_v51 }
 0xe51   :  { %v1740_v50 = vpop.f32.mrf.mxu0 }
 0xe54   :  { %v3068_v53 = vpop.eup %3067 }
 0xe55   :  { %v1745_v54 = vadd.f32 1.0, %v3068_v53 }
 0xe57   :  { %3069 = vrcp.f32 %v1745_v54  ;;  %v1757_v61 = vand.u32 2147483648, %v1745_v54  ;;  %vm1751_vm4 = vweird.f32 %v1745_v54  ;;  %v1755_v28 = vand.u32 2147483647, %v1745_v54 }
 0xe59   :  { %v1758_v62 = vor.u32 1.1754944e-38, %v1757_v61  ;;  %vm1756_vm1 = vcmp.eq.f32.partialorder %v1755_v28, 8.507059e+37 }
 0xe5d   :  { %v3070_v57 = vpop.eup %3069 }
 0xe5e   :  { %v1747_v58 = vmul.f32 %v3070_v57, %v1745_v54  ;;  %vm1752_vm3 = vweird.f32 %v3070_v57 }
 0xe5f   :  { %vm1753_vm5 = vmor %vm1751_vm4, %vm1752_vm3 }
 0xe60   :  { %v1748_v59 = vsub.f32 1.0, %v1747_v58 }
 0xe62   :  { %v1749_v19 = vmul.f32 %v3070_v57, %v1748_v59 }
 0xe64   :  { %v1750_v56 = vadd.f32 %v3070_v57, %v1749_v19 }
 0xe66   :  { %v1754_v31 = vsel %vm1753_vm5, %v3070_v57, %v1750_v56 }
 0xe67   :  { %v1759_v63 = vsel %vm1756_vm1, %v1758_v62, %v1754_v31 }
 0xea6   :  { %v1763_v42 = vpop.permute.xlu2 %1762 }
 0xea7   :  { %v1765_v47 = vmul.f32 %v1763_v42, %v1759_v63 }
 0xea9   :  { %1767 = vrot.lane.b32.xlu0 %v1765_v47, %s3141_s1 }
 0xf1b   :  { %v1768_v1 = vpop.permute.xlu0 %1767 }
 0xf1c   :  { %v1770_v2 = vadd.f32 %v1768_v1, %v1739_v49 }
 0xf1e   :  { %3071 = vtanh.f32 %v1770_v2 }
 0xf24   :  { %v3072_v3 = vpop.eup %3071 }
 0xf25   :  { %v1772_v5 = vsub.f32 %v3336_v18, %v3072_v3 }
 0xf27   :  { %1774 = vrot.lane.b32.xlu1 %v1772_v5, %s3142_s16 }
 0xf99   :  { %v1775_v6 = vpop.permute.xlu1 %1774 }
 0xf9a   :  { %v1777_v7 = vmul.f32 %v1775_v6, %v1759_v63  ;;  %v2985_v6 = vld [vmem:[%s3563_s5 + $0x58] sm:$0xff] }
 0xf9b   :  { %1910 = vmatpush.bf16.msrb.mxu3 %v2985_v6 }
 0xf9c   :  { %1779 = vrot.lane.b32.xlu2 %v1777_v7, %s3140_s15  ;;  %v2984_v7 = vld [vmem:[%s3563_s5 + $0x50] sm:$0xff] }
 0xf9f   :  { %1911 = vmatpush.bf16.msrb.mxu3 %v2984_v7 }
 0xfa3   :  { %2146 = vmatpush.bf16.msra.mxu3 %v3408_v36 }
 0xfa7   :  { %2147 = vmatpush.bf16.msra.mxu3 %v3417_v60 }
 0xff6   :  { %v1780_v9 = vpop.permute.xlu2 %1779 }
 0xff7   :  { %v1782_v10 = vadd.f32 %v3072_v3, %v1780_v9 }
 0xff9   :  { %v1783_v55 = vpack.c.bf16 %v1782_v10, %v1782_v10  ;;  %v1206_v10 = vperm.slane %v3394_v11, 2 }
 0xffb   :  { %1785 = vrot.lane.b32.xlu0 %v1783_v55, %s3141_s1  ;;  %v1408_v55 = vadd.f32 %v3367_v32, %v1206_v10 }
0x106d   :  { %v1786_v18 = vpop.permute.xlu0 %1785 }
0x106e   :  { %2783 = vmatmul.msk.bf16.vlgmr.msrb.gmra.mxu1 %vm473_vm0, %v1786_v18  ;;  %2797 = vmatmul.msk.bf16.vlgmr.msrb.gmra.mxu2 %vm473_vm0, %v1786_v18 }
0x10eb   :  { %v1799_v52 = vpop.f32.mrf.mxu1 }
0x10ec   :  { %v1800_v24 = vadd.f32 %v3463_v4, %v1799_v52 }
0x10ee   :  { %v1805_v26 = vsub.f32 %v1800_v24, %v2784_v20 }
0x10f0   :  { %v1806_v48 = vmul.f32 %v1805_v26, %v1805_v26 }
0x10f1   :  { %v1835_v37 = vpop.f32.mrf.mxu2 }
0x10f2   :  { %v1807_v8 = vmul.f32 %v3475_v27, %v1806_v48  ;;  %v1836_v39 = vadd.f32 %v1835_v37, %v720_v35 }
0x10f3   :  { %v1801_v40 = vpop.f32.mrf.mxu1 }
0x10f4   :  { %1859 = vrot.lane.b32.xlu1 %v1836_v39, %s3140_s15  ;;  %v3481_v46 = vadd.f32 %v1807_v8, %v1632_v38  ;;  %v2798_v50 = vmul.f32 -1.442695, %v1836_v39 }
0x10f6   :  { %3073 = vpow2.f32 %v2798_v50  ;;  %v2986_v50 = vld [vmem:[%s3563_s5 + $0x60] sm:$0xff] }
0x10f9   :  { %v1837_v49 = vpop.f32.mrf.mxu2 }
0x10fa   :  { %v2987_v49 = vld [vmem:[%s3563_s5 + $0x68] sm:$0xff] }
0x10fb   :  { %2007 = vmatpush.bf16.msra.mxu1 %v2987_v49 }
0x10fc   :  { %v3074_v51 = vpop.eup %3073 }
0x10fd   :  { %v1842_v53 = vadd.f32 1.0, %v3074_v51 }
0x10ff   :  { %3075 = vrcp.f32 %v1842_v53  ;;  %v1854_v19 = vand.u32 2147483648, %v1842_v53  ;;  %vm1848_vm9 = vweird.f32 %v1842_v53  ;;  %v1852_v56 = vand.u32 2147483647, %v1842_v53  ;;  %2008 = vmatpush.bf16.msra.mxu1 %v2986_v50 }
0x1101   :  { %v1855_v28 = vor.u32 1.1754944e-38, %v1854_v19  ;;  %vm1853_vm11 = vcmp.eq.f32.partialorder %v1852_v56, 8.507059e+37 }
0x1105   :  { %v3076_v54 = vpop.eup %3075 }
0x1106   :  { %v1844_v29 = vmul.f32 %v3076_v54, %v1842_v53  ;;  %vm1849_vm8 = vweird.f32 %v3076_v54 }
0x1107   :  { %vm1850_vm10 = vmor %vm1848_vm9, %vm1849_vm8 }
0x1108   :  { %v1845_v57 = vsub.f32 1.0, %v1844_v29  ;;  %v519_v29 = vperm.slane %v3374_v34, 3 }
0x110a   :  { %v1846_v58 = vmul.f32 %v3076_v54, %v1845_v57  ;;  %v733_v57 = vadd.f32 %v3288_v30, %v519_v29 }
0x110c   :  { %v1847_v59 = vadd.f32 %v3076_v54, %v1846_v58 }
0x110e   :  { %v1851_v61 = vsel %vm1850_vm10, %v3076_v54, %v1847_v59  ;;  %v2814_v59 = vld [vmem:[%s3558_s0 + $0x20] sm:$0xff] }
0x110f   :  { %v1856_v62 = vsel %vm1853_vm11, %v1855_v28, %v1851_v61 }
0x1166   :  { %v1860_v31 = vpop.permute.xlu1 %1859 }
0x1167   :  { %v1862_v42 = vmul.f32 %v1860_v31, %v1856_v62 }
0x1169   :  { %1864 = vrot.lane.b32.xlu2 %v1862_v42, %s3141_s1 }
0x11c3   :  { %v1865_v63 = vpop.permute.xlu2 %1864 }
0x11c4   :  { %v1867_v47 = vadd.f32 %v1865_v63, %v1836_v39 }
0x11c6   :  { %3077 = vtanh.f32 %v1867_v47 }
0x11cc   :  { %v3078_v1 = vpop.eup %3077 }
0x11cd   :  { %v1869_v2 = vsub.f32 %v3277_v23, %v3078_v1 }
0x11cf   :  { %1871 = vrot.lane.b32.xlu0 %v1869_v2, %s3142_s16 }
0x1241   :  { %v1872_v3 = vpop.permute.xlu0 %1871 }
0x1242   :  { %v1874_v5 = vmul.f32 %v1872_v3, %v1856_v62 }
0x1244   :  { %1876 = vrot.lane.b32.xlu1 %v1874_v5, %s3140_s15 }
0x12b6   :  { %v1877_v23 = vpop.permute.xlu1 %1876 }
0x12b7   :  { %v1879_v44 = vadd.f32 %v3078_v1, %v1877_v23 }
0x12b9   :  { %v1880_v43 = vpack.c.bf16 %v1879_v44, %v1879_v44 }
0x12bb   :  { %1887 = vrot.lane.b32.xlu2 %v1880_v43, %s3141_s1 }
0x1315   :  { %v1888_v9 = vpop.permute.xlu2 %1887 }
0x1316   :  { %2811 = vmatmul.msk.bf16.vlgmr.msrb.gmra.mxu3 %vm473_vm0, %v1888_v9 }
0x1399   :  { %v1913_v18 = vpop.f32.mrf.mxu3 }
0x139a   :  { %v1914_v41 = vadd.f32 %v1913_v18, %v1408_v55 }
0x139c   :  { %1937 = vrot.lane.b32.xlu0 %v1914_v41, %s3140_s15  ;;  %v2812_v36 = vmul.f32 -1.442695, %v1914_v41 }
0x139e   :  { %3079 = vpow2.f32 %v2812_v36 }
0x13a1   :  { %v1915_v12 = vpop.f32.mrf.mxu3 }
0x13a4   :  { %v3080_v60 = vpop.eup %3079 }
0x13a5   :  { %v1920_v13 = vadd.f32 1.0, %v3080_v60 }
0x13a7   :  { %3081 = vrcp.f32 %v1920_v13  ;;  %v1932_v22 = vand.u32 2147483648, %v1920_v13  ;;  %vm1926_vm13 = vweird.f32 %v1920_v13  ;;  %v1930_v24 = vand.u32 2147483647, %v1920_v13 }
0x13a9   :  { %v1933_v25 = vor.u32 1.1754944e-38, %v1932_v22  ;;  %vm1931_vm15 = vcmp.eq.f32.partialorder %v1930_v24, 8.507059e+37  ;;  %v1207_v22 = vperm.slane %v3394_v11, 3 }
0x13ab   :  { %v1421_v24 = vadd.f32 %v3369_v33, %v1207_v22 }
0x13ad   :  { %v3082_v15 = vpop.eup %3081 }
0x13ae   :  { %v1922_v16 = vmul.f32 %v3082_v15, %v1920_v13  ;;  %vm1927_vm12 = vweird.f32 %v3082_v15 }
0x13af   :  { %vm1928_vm14 = vmor %vm1926_vm13, %vm1927_vm12 }
0x13b0   :  { %v1923_v17 = vsub.f32 1.0, %v1922_v16  ;;  %v2988_v16 = vld [vmem:[%s3563_s5 + $0x70] sm:$0xff] }
0x13b2   :  { %v1924_v52 = vmul.f32 %v3082_v15, %v1923_v17 }
0x13b4   :  { %v1925_v20 = vadd.f32 %v3082_v15, %v1924_v52 }
0x13b6   :  { %v1929_v32 = vsel %vm1928_vm14, %v3082_v15, %v1925_v20  ;;  %v2989_v15 = vld [vmem:[%s3563_s5 + $0x78] sm:$0xff] }
0x13b7   :  { %v1934_v0 = vsel %vm1931_vm15, %v1933_v25, %v1929_v32  ;;  %2085 = vmatpush.bf16.msra.mxu2 %v2989_v15 }
0x13bb   :  { %2086 = vmatpush.bf16.msra.mxu2 %v2988_v16 }
0x140e   :  { %v1938_v26 = vpop.permute.xlu0 %1937 }
0x140f   :  { %v1940_v35 = vmul.f32 %v1938_v26, %v1934_v0 }
0x1411   :  { %1942 = vrot.lane.b32.xlu1 %v1940_v35, %s3141_s1 }
0x1483   :  { %v1943_v48 = vpop.permute.xlu1 %1942 }
0x1484   :  { %v1945_v37 = vadd.f32 %v1943_v48, %v1914_v41 }
0x1486   :  { %3083 = vtanh.f32 %v1945_v37 }
0x148c   :  { %v3084_v38 = vpop.eup %3083 }
0x148d   :  { %v1947_v8 = vsub.f32 %v3356_v14, %v3084_v38 }
0x148f   :  { %1949 = vrot.lane.b32.xlu2 %v1947_v8, %s3142_s16 }
0x14e9   :  { %v1950_v39 = vpop.permute.xlu2 %1949 }
0x14ea   :  { %v1952_v40 = vmul.f32 %v1950_v39, %v1934_v0 }
0x14ec   :  { %1954 = vrot.lane.b32.xlu0 %v1952_v40, %s3140_s15 }
0x155e   :  { %v1955_v51 = vpop.permute.xlu0 %1954 }
0x155f   :  { %v1957_v53 = vadd.f32 %v3084_v38, %v1955_v51 }
0x1561   :  { %v1958_v54 = vpack.c.bf16 %v1957_v53, %v1957_v53 }
0x1563   :  { %1960 = vrot.lane.b32.xlu1 %v1958_v54, %s3141_s1 }
0x15d5   :  { %v1961_v14 = vpop.permute.xlu1 %1960 }
0x15d6   :  { %2813 = vmatmul.msk.bf16.vlgmr.msra.gmra.mxu0 %vm473_vm0, %v1961_v14  ;;  %2827 = vmatmul.msk.bf16.vlgmr.msra.gmra.mxu1 %vm473_vm0, %v1961_v14 }
0x1653   :  { %v1974_v58 = vpop.f32.mrf.mxu0  ;;  %v2010_v19 = vpop.f32.mrf.mxu1 }
0x1654   :  { %v1975_v56 = vadd.f32 %v3463_v4, %v1974_v58  ;;  %v2011_v61 = vadd.f32 %v2010_v19, %v733_v57 }
0x1656   :  { %v1980_v28 = vsub.f32 %v1975_v56, %v2814_v59  ;;  %2034 = vrot.lane.b32.xlu2 %v2011_v61, %s3140_s15  ;;  %v2828_v30 = vmul.f32 -1.442695, %v2011_v61 }
0x1658   :  { %v1981_v31 = vmul.f32 %v1980_v28, %v1980_v28  ;;  %3085 = vpow2.f32 %v2828_v30 }
0x165a   :  { %v1982_v62 = vmul.f32 %v3475_v27, %v1981_v31 }
0x165b   :  { %v1976_v42 = vpop.f32.mrf.mxu0  ;;  %v2012_v63 = vpop.f32.mrf.mxu1 }
0x165c   :  { %v3522_v34 = vadd.f32 %v1982_v62, %v3481_v46  ;;  %v2153_v42 = vld [vmem:[%s3560_s2] sm:$0xff] }
0x165e   :  { %v3086_v47 = vpop.eup %3085 }
0x165f   :  { %v2017_v1 = vadd.f32 1.0, %v3086_v47 }
0x1661   :  { %3087 = vrcp.f32 %v2017_v1  ;;  %v2029_v23 = vand.u32 2147483648, %v2017_v1  ;;  %vm2023_vm4 = vweird.f32 %v2017_v1  ;;  %v2027_v44 = vand.u32 2147483647, %v2017_v1 }
0x1663   :  { %v2030_v9 = vor.u32 1.1754944e-38, %v2029_v23  ;;  %vm2028_vm1 = vcmp.eq.f32.partialorder %v2027_v44, 8.507059e+37 }
0x1667   :  { %v3088_v2 = vpop.eup %3087 }
0x1668   :  { %v2019_v3 = vmul.f32 %v3088_v2, %v2017_v1  ;;  %vm2024_vm3 = vweird.f32 %v3088_v2 }
0x1669   :  { %vm2025_vm5 = vmor %vm2023_vm4, %vm2024_vm3 }
0x166a   :  { %v2020_v5 = vsub.f32 1.0, %v2019_v3 }
0x166c   :  { %v2021_v6 = vmul.f32 %v3088_v2, %v2020_v5 }
0x166e   :  { %v2022_v7 = vadd.f32 %v3088_v2, %v2021_v6 }
0x1670   :  { %v2026_v43 = vsel %vm2025_vm5, %v3088_v2, %v2022_v7 }
0x1671   :  { %v2031_v10 = vsel %vm2028_vm1, %v2030_v9, %v2026_v43 }
0x16b0   :  { %v2035_v46 = vpop.permute.xlu2 %2034 }
0x16b1   :  { %v2037_v55 = vmul.f32 %v2035_v46, %v2031_v10 }
0x16b3   :  { %2039 = vrot.lane.b32.xlu0 %v2037_v55, %s3141_s1 }
0x1725   :  { %v2040_v18 = vpop.permute.xlu0 %2039 }
0x1726   :  { %v2042_v41 = vadd.f32 %v2040_v18, %v2011_v61 }
0x1728   :  { %3089 = vtanh.f32 %v2042_v41 }
0x172e   :  { %v3090_v12 = vpop.eup %3089 }
0x172f   :  { %v2044_v36 = vsub.f32 %v3266_v45, %v3090_v12 }
0x1731   :  { %2046 = vrot.lane.b32.xlu1 %v2044_v36, %s3142_s16 }
0x17a3   :  { %v2047_v60 = vpop.permute.xlu1 %2046 }
0x17a4   :  { %v2049_v13 = vmul.f32 %v2047_v60, %v2031_v10 }
0x17a6   :  { %2051 = vrot.lane.b32.xlu2 %v2049_v13, %s3140_s15 }
0x1800   :  { %v2052_v17 = vpop.permute.xlu2 %2051 }
0x1801   :  { %v2054_v52 = vadd.f32 %v3090_v12, %v2052_v17 }
0x1803   :  { %v2055_v20 = vpack.c.bf16 %v2054_v52, %v2054_v52 }
0x1805   :  { %2062 = vrot.lane.b32.xlu0 %v2055_v20, %s3141_s1 }
0x1877   :  { %v2063_v45 = vpop.permute.xlu0 %2062 }
0x1878   :  { %2841 = vmatmul.msk.bf16.vlgmr.msra.gmra.mxu2 %vm473_vm0, %v2063_v45 }
0x18fb   :  { %v2088_v32 = vpop.f32.mrf.mxu2 }
0x18fc   :  { %v2089_v25 = vadd.f32 %v2088_v32, %v1421_v24 }
0x18fe   :  { %2112 = vrot.lane.b32.xlu1 %v2089_v25, %s3140_s15  ;;  %v2842_v0 = vmul.f32 -1.442695, %v2089_v25 }
0x1900   :  { %3091 = vpow2.f32 %v2842_v0 }
0x1903   :  { %v2090_v26 = vpop.f32.mrf.mxu2 }
0x1906   :  { %v3092_v35 = vpop.eup %3091 }
0x1907   :  { %v2095_v48 = vadd.f32 1.0, %v3092_v35 }
0x1909   :  { %3093 = vrcp.f32 %v2095_v48  ;;  %v2107_v49 = vand.u32 2147483648, %v2095_v48  ;;  %vm2101_vm6 = vweird.f32 %v2095_v48  ;;  %v2105_v11 = vand.u32 2147483647, %v2095_v48 }
0x190b   :  { %v2108_v50 = vor.u32 1.1754944e-38, %v2107_v49  ;;  %vm2106_vm8 = vcmp.eq.f32.partialorder %v2105_v11, 8.507059e+37 }
0x190f   :  { %v3094_v37 = vpop.eup %3093 }
0x1910   :  { %v2097_v38 = vmul.f32 %v3094_v37, %v2095_v48  ;;  %vm2102_vm2 = vweird.f32 %v3094_v37 }
0x1911   :  { %vm2103_vm7 = vmor %vm2101_vm6, %vm2102_vm2 }
0x1912   :  { %v2098_v8 = vsub.f32 1.0, %v2097_v38 }
0x1914   :  { %v2099_v39 = vmul.f32 %v3094_v37, %v2098_v8 }
0x1916   :  { %v2100_v40 = vadd.f32 %v3094_v37, %v2099_v39 }
0x1918   :  { %v2104_v33 = vsel %vm2103_vm7, %v3094_v37, %v2100_v40 }
0x1919   :  { %v2109_v53 = vsel %vm2106_vm8, %v2108_v50, %v2104_v33 }
0x1970   :  { %v2113_v51 = vpop.permute.xlu1 %2112 }
0x1971   :  { %v2115_v54 = vmul.f32 %v2113_v51, %v2109_v53 }
0x1973   :  { %2117 = vrot.lane.b32.xlu2 %v2115_v54, %s3141_s1 }
0x19cd   :  { %v2118_v14 = vpop.permute.xlu2 %2117 }
0x19ce   :  { %v2120_v29 = vadd.f32 %v2118_v14, %v2089_v25 }
0x19d0   :  { %3095 = vtanh.f32 %v2120_v29 }
0x19d6   :  { %v3096_v57 = vpop.eup %3095 }
0x19d7   :  { %v2122_v58 = vsub.f32 %v3344_v21, %v3096_v57 }
0x19d9   :  { %2124 = vrot.lane.b32.xlu0 %v2122_v58, %s3142_s16 }
0x1a4b   :  { %v2125_v59 = vpop.permute.xlu0 %2124 }
0x1a4c   :  { %v2127_v19 = vmul.f32 %v2125_v59, %v2109_v53 }
0x1a4e   :  { %2129 = vrot.lane.b32.xlu1 %v2127_v19, %s3140_s15 }
0x1ac0   :  { %v2130_v56 = vpop.permute.xlu1 %2129 }
0x1ac1   :  { %v2132_v61 = vadd.f32 %v3096_v57, %v2130_v56 }
0x1ac3   :  { %v2133_v28 = vpack.c.bf16 %v2132_v61, %v2132_v61 }
0x1ac5   :  { %2135 = vrot.lane.b32.xlu2 %v2133_v28, %s3141_s1 }
0x1b1f   :  { %v2136_v31 = vpop.permute.xlu2 %2135 }
0x1b20   :  { %2843 = vmatmul.msk.bf16.vlgmr.msra.gmra.mxu3 %vm473_vm0, %v2136_v31 }
0x1ba3   :  { %v2149_v62 = vpop.f32.mrf.mxu3 }
0x1ba4   :  { %v2150_v21 = vadd.f32 %v3463_v4, %v2149_v62 }
0x1ba6   :  { %v2154_v63 = vsub.f32 %v2150_v21, %v2153_v42  ;;  %2158 = vst [vmem:[%s3565_s7] sm:$0xff] %v2150_v21  ;;  %s2179_s7 = sshll.u32 %s3566_s8, 4  ;;  %s2180_s7 = int_to_ptr.hbm [resolvable:$true] %s2179_s7 }
0x1ba8   :  { %v2155_v30 = vmul.f32 %v2154_v63, %v2154_v63 }
0x1baa   :  { %v2156_v47 = vmul.f32 %v3475_v27, %v2155_v30 }
0x1bab   :  { %v2151_v1 = vpop.f32.mrf.mxu3 }
0x1bac   :  { %v2157_v2 = vadd.f32 %v2156_v47, %v3522_v34 }
0x1bae   :  { %v2159_v3 = vsel %vm473_vm0, %v2157_v2, 0.0 }
0x1baf   :  { %2160 = vadd.xlane.f32.xlu0 %v2159_v3 }
0x1c22   :  { %v2161_v5 = vpop.xlane.xlu0 %2160 }
0x1c23   :  { %v2162_v6 = vrot.slane %v2161_v5, 4 }
0x1c25   :  { %v2163_v7 = vadd.f32 %v2162_v6, %v2161_v5 }
0x1c27   :  { %v2164_v23 = vrot.slane %v2163_v7, 2 }
0x1c29   :  { %v2165_v44 = vadd.f32 %v2164_v23, %v2163_v7 }
0x1c2b   :  { %v2166_v4 = vrot.slane %v2165_v44, 1 }
0x1c2d   :  { %v2167_v43 = vadd.f32 %v2166_v4, %v2165_v44 }
0x1c2f   :  { %2990 = vpush %v2167_v43 }
0x1c60   :  { %s2991_s1 = spop %2990 }
0x1c61   :  { %s2169_s25 = smul.f32 0.015625, %s2991_s1 }
0x1c63   :  { %2171 = sst [smem:[#allocation5]] %s2169_s25 }
0x1c64   :  { %2182 = dma.smem_to_hbm %s3144_s26, 16, %s2180_s7, [#allocation4]  }
0x1c65   :  { %3135 = dma.done.wait [#allocation4], 16  }
0x1c66   :  { %3136 = vsyncadd [#allocation4], 4294967280 }
0x1c67   :  { %2189 = sfence }
0x1c68   :  { %2190 = vsyncpa [#allocation3], 1 }
0x1c69   :  { %2191 = vsyncpa [#allocation4], 1 }

</bundles_post_ra>
